<compile_context>
chip_gen: v5e
topology: v5e:2x2
jax: 0.10.0
libtpu: 0.0.40
codegen_flags: <defaults>
</compile_context>

<pallas_src>
import functools

import numpy as np
import jax
import jax.numpy as jnp
from jax.experimental import pallas as pl
from jax.experimental.pallas import tpu as pltpu


def _round_up(x, m):
    return ((x + m - 1) // m) * m


# ----------------------------------------------------------------------------
# Offset precomputation (mirrors NghSampler.precompute_offsets)
# ----------------------------------------------------------------------------
def _precompute_offsets(ngh, sub_d, pos_d, neg_d):
    pos_d2 = pos_d ** 2
    neg_d2 = neg_d ** 2
    rad2 = ngh ** 2
    rad = ngh // sub_d * ngh
    pos, neg = [], []
    for j in range(-rad, rad + 1, sub_d):
        for i in range(-rad, rad + 1, sub_d):
            d2 = i * i + j * j
            if d2 <= pos_d2:
                pos.append((i, j))
            elif neg_d2 <= d2 <= rad2:
                neg.append((i, j))
    pos = np.asarray(pos, dtype=np.int32).reshape(-1, 2).T  # (2, P): [x; y]
    neg = np.asarray(neg, dtype=np.int32).reshape(-1, 2).T  # (2, Q)
    return jnp.asarray(pos), jnp.asarray(neg)


# ----------------------------------------------------------------------------
# Grid generation (mirrors NghSampler.gen_grid; torch.randint -> jax.random)
# ----------------------------------------------------------------------------
def _gen_grid(step, B, H, W, border, key):
    b1 = jnp.arange(B, dtype=jnp.int32)
    if step > 0:
        x1 = jnp.arange(border, W - border, step, dtype=jnp.int32)
        y1 = jnp.arange(border, H - border, step, dtype=jnp.int32)
        H1, W1 = len(y1), len(x1)
        shape = (B, H1, W1)
        x1 = jnp.broadcast_to(x1[None, None, :], shape).reshape(-1)
        y1 = jnp.broadcast_to(y1[None, :, None], shape).reshape(-1)
        b1 = jnp.broadcast_to(b1[:, None, None], shape).reshape(-1)
    else:
        n = (H - 2 * border) * (W - 2 * border) // step ** 2
        kx, ky = jax.random.split(key)
        x1 = jax.random.randint(kx, (n,), border, W - border, dtype=jnp.int32)
        y1 = jax.random.randint(ky, (n,), border, H - border, dtype=jnp.int32)
        x1 = jnp.broadcast_to(x1[None, :], (B, n)).reshape(-1)
        y1 = jnp.broadcast_to(y1[None, :], (B, n)).reshape(-1)
        b1 = jnp.broadcast_to(b1[:, None], (B, n)).reshape(-1)
        shape = (B, n)
    return b1, y1, x1, shape


# ----------------------------------------------------------------------------
# VMEM budgeting (generation-aware) and N-tile selection
# ----------------------------------------------------------------------------
def _vmem_budget():
    cap = 64 << 20  # conservative fallback == v7x per-TensorCore VMEM
    try:
        cap = int(pltpu.get_tpu_info().vmem_capacity_bytes)
    except Exception:
        pass
    # v5e/v6e (128 MiB): limit 96 MiB, budget 72 MiB.
    # v7x (64 MiB/TC):   limit 48 MiB, budget 36 MiB.
    limit = min(cap * 3 // 4, 96 << 20)
    budget = limit * 3 // 4
    return budget, limit


def _buf_bytes(shape, itemsize):
    """Conservative padded-tile VMEM size (lane pad 128, sublane pad 8)."""
    dims = list(shape)
    dims[-1] = _round_up(dims[-1], 128)
    if len(dims) >= 2:
        dims[-2] = _round_up(dims[-2], 8)
    n = 1
    for d in dims:
        n *= d
    return n * itemsize


def _pick_tn(N, C, PQ, Mpad, cols, vmem_budget, stream_itemsize):
    npad8 = _round_up(max(N, 1), 8)
    # Pallas double-buffers every input, including grid-invariant ones.
    resident = 2 * (_buf_bytes((C, Mpad), stream_itemsize)      # distractorsT
                    + _buf_bytes((2, Mpad), 4))                 # distr. coords
    for tn in (1024, 512, 256, 128, 64, 32, 16, 8):
        streamed = 2 * (_buf_bytes((tn, C), stream_itemsize)    # feat1
                        + _buf_bytes((tn, C, PQ), stream_itemsize)  # pos+neg
                        + _buf_bytes((tn, 2), 4)                # query coords
                        + _buf_bytes((tn, cols), 4))            # fused output
        temps = (_buf_bytes((tn, C), 4)                         # f1 upcast
                 + 2 * _buf_bytes((tn, C, PQ), 4)               # upcast+product
                 + _buf_bytes((tn, PQ), 4)                      # pn
                 + 4 * _buf_bytes((tn, Mpad), 4))               # d, dx, dy, d2
        total = (streamed + resident + temps) * 12 // 10        # +20% margin
        if total <= vmem_budget:
            return min(tn, npad8)
    return min(8, npad8)


# ----------------------------------------------------------------------------
# Pallas kernel: fused pos/neg/distractor scores + distance masking
# ----------------------------------------------------------------------------
def _ngh_scores_kernel(neg_d2, pq, pq_pad, f1_ref, pnf_ref, dfeatT_ref,
                       qxy_ref, dxy_ref, out_ref):
    f1_s = f1_ref[...]                                   # (TN, C) bf16/f32
    f1 = f1_s.astype(jnp.float32)
    pnf = pnf_ref[...].astype(jnp.float32)               # (TN, C, PQ)

    # pn[n, i] = sum_k feat1[n, k] * feat2[b, k, y2+dy_i, x2+dx_i]
    # channels on sublanes, neighbours on lanes -> cheap sublane reduce.
    pn = jnp.sum(f1[:, :, None] * pnf, axis=1)           # (TN, PQ)

    # dscores = feat1 @ distractors (contract over C) on the MXU, f32 acc.
    d = jnp.dot(f1_s, dfeatT_ref[...],
                preferred_element_type=jnp.float32)      # (TN, Mpad)

    # squared euclidean distance between batch-offset query / distractor
    # coordinates (dist2 < neg_d^2  <=>  dist < neg_d).
    qxy = qxy_ref[...]                                   # (TN, 2)
    dxy = dxy_ref[...]                                   # (2, Mpad)
    dx = qxy[:, 0:1] - dxy[0:1, :]                       # (TN, Mpad)
    dy = qxy[:, 1:2] - dxy[1:2, :]
    dist2 = dx * dx + dy * dy
    d = jnp.where(dist2 < neg_d2, 0.0, d)

    # pn: one small masked slice-store; d: lane-aligned unmasked store.
    out_ref[:, :pq] = pn
    out_ref[:, pq_pad:] = d


def _compute_scores(f1, pnf, dfeatT, qxy, dxy, neg_d,
                    stream_dtype=jnp.bfloat16):
    N, C = f1.shape
    PQ = pnf.shape[2]
    Mpad = dfeatT.shape[1]
    PQ_pad = _round_up(PQ, 128)
    COLS = PQ_pad + Mpad

    stream_itemsize = jnp.dtype(stream_dtype).itemsize
    budget, limit = _vmem_budget()
    TN = _pick_tn(N, C, PQ, Mpad, COLS, budget, stream_itemsize)
    Npad = pl.cdiv(N, TN) * TN
    pad = Npad - N
    if pad:
        f1 = jnp.pad(f1, ((0, pad), (0, 0)))
        pnf = jnp.pad(pnf, ((0, pad), (0, 0), (0, 0)))
        qxy = jnp.pad(qxy, ((0, pad), (0, 0)))

    kernel = functools.partial(_ngh_scores_kernel,
                               float(neg_d * neg_d), PQ, PQ_pad)
    flops = int(2 * Npad * Mpad * C + 2 * Npad * PQ * C + 5 * Npad * Mpad)
    bytes_accessed = int(
        stream_itemsize * (Npad * C + Npad * C * PQ + C * Mpad)
        + 4 * (2 * Npad + 2 * Mpad + Npad * COLS))

    out = pl.pallas_call(
        kernel,
        out_shape=jax.ShapeDtypeStruct((Npad, COLS), jnp.float32),
        grid_spec=pltpu.PrefetchScalarGridSpec(
            num_scalar_prefetch=0,
            grid=(Npad // TN,),
            in_specs=[
                pl.BlockSpec((TN, C), lambda i: (i, 0)),         # feat1
                pl.BlockSpec((TN, C, PQ), lambda i: (i, 0, 0)),  # pos+neg nghs
                pl.BlockSpec((C, Mpad), lambda i: (0, 0)),       # distractorsT
                pl.BlockSpec((TN, 2), lambda i: (i, 0)),         # query coords
                pl.BlockSpec((2, Mpad), lambda i: (0, 0)),       # distr. coords
            ],
            out_specs=pl.BlockSpec((TN, COLS), lambda i: (i, 0)),
        ),
        compiler_params=pltpu.CompilerParams(
            dimension_semantics=("parallel",),      # independent N tiles
            vmem_limit_bytes=int(limit)),
        cost_estimate=pl.CostEstimate(
            flops=flops, transcendentals=0, bytes_accessed=bytes_accessed),
    )(f1.astype(stream_dtype), pnf.astype(stream_dtype),
      dfeatT.astype(stream_dtype), qxy, dxy)
    return out[:N], PQ_pad


# ----------------------------------------------------------------------------
# Forward pass (mirrors NghSampler.forward)
# ----------------------------------------------------------------------------
def ngh_sampler_forward(feats, confs, aflow, params, key,
                        stream_dtype=jnp.bfloat16):
    ngh = params["ngh"]
    sub_q = params["subq"]
    sub_d = params["subd"]
    pos_d = params["pos_d"]
    neg_d = params["neg_d"]
    border = params["border"] if params["border"] is not None else ngh
    sub_d_neg = params["subd_neg"]
    assert 0 <= pos_d < neg_d <= (ngh if ngh else 99)
    assert sub_d <= ngh or ngh == 0
    assert sub_q != 0
    assert border >= ngh
    assert sub_d_neg, "reference module only defines scores when sub_d_neg != 0"

    B, two, H, W = aflow.shape
    assert two == 2
    feat1_map, feat2_map = feats
    conf1_map = confs[0] if confs else None

    pos_off, neg_off = _precompute_offsets(ngh, sub_d, pos_d, neg_d)
    P = pos_off.shape[1]
    all_off = jnp.concatenate((pos_off, neg_off), axis=1)              # (2, P+Q)
    PQ = all_off.shape[1]

    kq, kd = jax.random.split(key)
    b_, y1, x1, shape = _gen_grid(sub_q, B, H, W, border, kq)

    feat1 = feat1_map[b_, :, y1, x1]                                   # (N, C)
    qconf = (conf1_map[b_, :, y1, x1].reshape(shape) if confs else None)

    xy2 = (aflow[b_, :, y1, x1] + 0.5).astype(jnp.int32).T             # (2, N)
    mask = ((0 <= xy2[0]) & (0 <= xy2[1]) &
            (xy2[0] < W) & (xy2[1] < H)).reshape(shape)

    def clamp(xy):
        return jnp.stack((jnp.clip(xy[0], 0, W - 1),
                          jnp.clip(xy[1], 0, H - 1)))

    # bf16 streaming of feat2-derived operands (f32 accumulation in-kernel).
    feat2_s = feat2_map.astype(stream_dtype)

    # TODO(synk): for production image sizes, move this advanced-indexing
    # gather into the kernel (keep feat2 in HBM via memory_space=pl.ANY,
    # scalar-prefetch the integer (b, x2, y2) per query tile and manually
    # double-buffer (2*ngh+1)^2 x C windows with make_async_copy) to avoid
    # materializing the (N, C, P+Q) tensor in HBM.
    xy2pn = clamp(xy2[:, None, :] + all_off[:, :, None])               # (2, PQ, N)
    # channels on sublanes, neighbours on lanes: (N, C, PQ)
    pnf = jnp.transpose(feat2_s[b_, :, xy2pn[1], xy2pn[0]], (1, 2, 0))

    # distractors, pre-transposed for the MXU and padded to a lane multiple
    b3, y3, x3, _ = _gen_grid(sub_d_neg, B, H, W, border, kd)
    M = int(b3.shape[0])
    Mpad = _round_up(M, 128)
    dfeatT = feat2_s[b3, :, y3, x3].T                                  # (C, M)
    if Mpad != M:
        dfeatT = jnp.pad(dfeatT, ((0, 0), (0, Mpad - M)))

    # batch-disambiguation offset: reference hard-codes 512 (collides when
    # H or W >= 512); max(512, H, W) + neg_d is identical in the reference
    # regime and guarantees cross-batch separation beyond it.
    off = float(max(512, H, W) + neg_d)
    qxy = (xy2.astype(jnp.float32)
           + b_[None, :].astype(jnp.float32) * off).T                  # (N, 2)
    dxy = (jnp.stack((x3, y3)).astype(jnp.float32)
           + b3[None, :].astype(jnp.float32) * off)                    # (2, M)
    if Mpad != M:
        dxy = jnp.pad(dxy, ((0, 0), (0, Mpad - M)), constant_values=1e9)

    out, PQ_pad = _compute_scores(feat1, pnf, dfeatT, qxy, dxy, neg_d,
                                  stream_dtype)                        # (N, cols)
    # compact padded columns back to the reference layout [pos | neg | distr.]
    scores = jnp.concatenate((out[:, :PQ], out[:, PQ_pad:PQ_pad + M]), axis=1)
    gt = jnp.zeros(scores.shape, dtype=jnp.uint8).at[:, :P].set(1)
    return scores, gt, mask, qconf


# ----------------------------------------------------------------------------
if __name__ == "__main__":
    key = jax.random.PRNGKey(0)
    B, C, H, W = 2, 32, 64, 64
    k1, k2, k3, k4, k5, ksamp = jax.random.split(key, 6)

    feat1 = jax.random.normal(k1, (B, C, H, W), dtype=jnp.float32)
    feat2 = jax.random.normal(k2, (B, C, H, W), dtype=jnp.float32)
    feat1 = feat1 / jnp.linalg.norm(feat1, axis=1, keepdims=True)
    feat2 = feat2 / jnp.linalg.norm(feat2, axis=1, keepdims=True)
    conf1 = jax.nn.sigmoid(jax.random.normal(k3, (B, 1, H, W), dtype=jnp.float32))
    conf2 = jax.nn.sigmoid(jax.random.normal(k4, (B, 1, H, W), dtype=jnp.float32))

    # dense flow ~ identity correspondence + noise (some targets out of bounds)
    xs = jnp.arange(W, dtype=jnp.float32)
    ys = jnp.arange(H, dtype=jnp.float32)
    gx, gy = jnp.meshgrid(xs, ys)
    base = jnp.stack((gx, gy))[None]                    # (1, 2, H, W)
    aflow = base + 3.0 * jax.random.normal(k5, (B, 2, H, W), dtype=jnp.float32)

    params = dict(ngh=6, subq=-8, subd=1, pos_d=2, neg_d=4,
                  border=16, subd_neg=-8)

    # TODO(synk): torch.randint sampling replaced with jax.random.randint
    # (same distribution / semantics, different RNG stream).
    scores, gt, mask, qconf = ngh_sampler_forward(
        (feat1, feat2), (conf1, conf2), aflow, params, ksamp)

    jax.block_until_ready(scores)
    jax.block_until_ready(gt)
    jax.block_until_ready(mask)
    jax.block_until_ready(qconf)
    print("KERNEL_OK")
</pallas_src>

<mosaic_0001>
module attributes {stable_mosaic.version = 11 : i64} {
  func.func @_ngh_scores_kernel(%arg0: i32, %arg1: memref<32x32xbf16, #tpu.memory_space<vmem>>, %arg2: memref<32x32x81xbf16, #tpu.memory_space<vmem>>, %arg3: memref<32x128xbf16, #tpu.memory_space<vmem>>, %arg4: memref<32x2xf32, #tpu.memory_space<vmem>>, %arg5: memref<2x128xf32, #tpu.memory_space<vmem>>, %arg6: memref<32x256xf32, #tpu.memory_space<vmem>>) attributes {dimension_semantics = [#tpu.dimension_semantics<parallel>], iteration_bounds = array<i64: 1>, scalar_prefetch = 0 : i64, scratch_operands = 0 : i64, tpu.core_type = #tpu.core_type<tc>, window_params = [{transform_indices = @transform_0, window_bounds = array<i64: 32, 32>}, {transform_indices = @transform_1, window_bounds = array<i64: 32, 32, 81>}, {pipeline_mode = #tpu.pipeline_mode<synchronous>, transform_indices = @transform_2, window_bounds = array<i64: 32, 128>}, {transform_indices = @transform_3, window_bounds = array<i64: 32, 2>}, {pipeline_mode = #tpu.pipeline_mode<synchronous>, transform_indices = @transform_4, window_bounds = array<i64: 2, 128>}, {transform_indices = @transform_5, window_bounds = array<i64: 32, 256>}]} {
    %c0 = arith.constant 0 : index
    %c0_0 = arith.constant 0 : index
    %0 = vector.load %arg1[%c0, %c0_0] : memref<32x32xbf16, #tpu.memory_space<vmem>>, vector<32x32xbf16>
    %1 = arith.extf %0 : vector<32x32xbf16> to vector<32x32xf32>
    %c0_1 = arith.constant 0 : index
    %c0_2 = arith.constant 0 : index
    %c0_3 = arith.constant 0 : index
    %2 = vector.load %arg2[%c0_1, %c0_2, %c0_3] : memref<32x32x81xbf16, #tpu.memory_space<vmem>>, vector<32x32x81xbf16>
    %3 = arith.extf %2 : vector<32x32x81xbf16> to vector<32x32x81xf32>
    %4 = vector.shape_cast %1 : vector<32x32xf32> to vector<32x32x1xf32>
    %5 = vector.broadcast %4 : vector<32x32x1xf32> to vector<32x32x81xf32>
    %6 = arith.mulf %5, %3 : vector<32x32x81xf32>
    %cst = arith.constant dense<0.000000e+00> : vector<32x81xf32>
    %7 = vector.multi_reduction <add>, %6, %cst [1] : vector<32x32x81xf32> to vector<32x81xf32>
    %c0_4 = arith.constant 0 : index
    %c0_5 = arith.constant 0 : index
    %8 = vector.load %arg3[%c0_4, %c0_5] : memref<32x128xbf16, #tpu.memory_space<vmem>>, vector<32x128xbf16>
    %cst_6 = arith.constant dense<0.000000e+00> : vector<32x128xf32>
    %9 = tpu.matmul %0, %8, %cst_6 {dimension_numbers = #tpu.dot_dimension_numbers<[1], [0], [0], [1], [0, 0, 1, 1], [], []>} : vector<32x32xbf16>, vector<32x128xbf16>, vector<32x128xf32> -> vector<32x128xf32>
    %c0_7 = arith.constant 0 : index
    %c0_8 = arith.constant 0 : index
    %10 = vector.load %arg4[%c0_7, %c0_8] : memref<32x2xf32, #tpu.memory_space<vmem>>, vector<32x2xf32>
    %c0_9 = arith.constant 0 : index
    %c0_10 = arith.constant 0 : index
    %11 = vector.load %arg5[%c0_9, %c0_10] : memref<2x128xf32, #tpu.memory_space<vmem>>, vector<2x128xf32>
    %12 = vector.extract_strided_slice %10 {offsets = [0, 0], sizes = [32, 1], strides = [1, 1]} : vector<32x2xf32> to vector<32x1xf32>
    %13 = vector.extract_strided_slice %11 {offsets = [0, 0], sizes = [1, 128], strides = [1, 1]} : vector<2x128xf32> to vector<1x128xf32>
    %14 = vector.broadcast %12 : vector<32x1xf32> to vector<32x128xf32>
    %15 = vector.broadcast %13 : vector<1x128xf32> to vector<32x128xf32>
    %16 = arith.subf %14, %15 : vector<32x128xf32>
    %17 = vector.extract_strided_slice %10 {offsets = [0, 1], sizes = [32, 1], strides = [1, 1]} : vector<32x2xf32> to vector<32x1xf32>
    %18 = vector.extract_strided_slice %11 {offsets = [1, 0], sizes = [1, 128], strides = [1, 1]} : vector<2x128xf32> to vector<1x128xf32>
    %19 = vector.broadcast %17 : vector<32x1xf32> to vector<32x128xf32>
    %20 = vector.broadcast %18 : vector<1x128xf32> to vector<32x128xf32>
    %21 = arith.subf %19, %20 : vector<32x128xf32>
    %22 = arith.mulf %16, %16 : vector<32x128xf32>
    %23 = arith.mulf %21, %21 : vector<32x128xf32>
    %24 = arith.addf %22, %23 : vector<32x128xf32>
    %cst_11 = arith.constant 1.600000e+01 : f32
    %25 = vector.broadcast %cst_11 : f32 to vector<32x128xf32>
    %26 = arith.cmpf olt, %24, %25 : vector<32x128xf32>
    %cst_12 = arith.constant 0.000000e+00 : f32
    %27 = vector.broadcast %cst_12 : f32 to vector<32x128xf32>
    %28 = arith.select %26, %27, %9 : vector<32x128xi1>, vector<32x128xf32>
    %c0_13 = arith.constant 0 : index
    %c0_14 = arith.constant 0 : index
    %29 = vector.load %arg6[%c0_13, %c0_14] : memref<32x256xf32, #tpu.memory_space<vmem>>, vector<32x81xf32>
    tpu.vector_store %arg6[%c0_13, %c0_14], %7 {strides = array<i32>} : memref<32x256xf32, #tpu.memory_space<vmem>>, vector<32x81xf32>,
    %c0_15 = arith.constant 0 : index
    %c128 = arith.constant 128 : index
    %30 = vector.load %arg6[%c0_15, %c128] : memref<32x256xf32, #tpu.memory_space<vmem>>, vector<32x128xf32>
    tpu.vector_store %arg6[%c0_15, %c128], %28 {strides = array<i32>} : memref<32x256xf32, #tpu.memory_space<vmem>>, vector<32x128xf32>,
    return
  }
  func.func @transform_0(%arg0: i32) -> (i32, i32) {
    %c0_i32 = arith.constant 0 : i32
    %c0_i32_0 = arith.constant 0 : i32
    return %arg0, %c0_i32 : i32, i32
  }
  func.func @transform_1(%arg0: i32) -> (i32, i32, i32) {
    %c0_i32 = arith.constant 0 : i32
    %c0_i32_0 = arith.constant 0 : i32
    %c0_i32_1 = arith.constant 0 : i32
    return %arg0, %c0_i32, %c0_i32_0 : i32, i32, i32
  }
  func.func @transform_2(%arg0: i32) -> (i32, i32) {
    %c0_i32 = arith.constant 0 : i32
    %c0_i32_0 = arith.constant 0 : i32
    %c0_i32_1 = arith.constant 0 : i32
    return %c0_i32, %c0_i32_0 : i32, i32
  }
  func.func @transform_3(%arg0: i32) -> (i32, i32) {
    %c0_i32 = arith.constant 0 : i32
    %c0_i32_0 = arith.constant 0 : i32
    return %arg0, %c0_i32 : i32, i32
  }
  func.func @transform_4(%arg0: i32) -> (i32, i32) {
    %c0_i32 = arith.constant 0 : i32
    %c0_i32_0 = arith.constant 0 : i32
    %c0_i32_1 = arith.constant 0 : i32
    return %c0_i32, %c0_i32_0 : i32, i32
  }
  func.func @transform_5(%arg0: i32) -> (i32, i32) {
    %c0_i32 = arith.constant 0 : i32
    %c0_i32_0 = arith.constant 0 : i32
    return %arg0, %c0_i32 : i32, i32
  }
}

</mosaic_0001>

<bundles_post_ra>
// kernel: tpu_custom_call.1
= control target key start
LH: loop header
LB: loop body
LE: loop exit
PB: predicated region body
PF: predicated region fallthrough
CT: control target
= control target key end

     0   :  { %10 = vsyncpa [#allocation3], 0  ;;  %s3156_s0 = inlined_call_operand.vmem [shape: bf16[32,32], index: 0, kind: input, shape index: {}]   ;;  %s3157_s1 = inlined_call_operand.hbm [shape: bf16[32,32,81], index: 1, kind: input, shape index: {}]   ;;  %s3158_s2 = inlined_call_operand.vmem [shape: bf16[32,128], index: 2, kind: input, shape index: {}]   ;;  %s3159_s3 = inlined_call_operand.vmem [shape: f32[32,2], index: 3, kind: input, shape index: {}]   ;;  %s3160_s4 = inlined_call_operand.vmem [shape: f32[2,128], index: 4, kind: input, shape index: {}]   ;;  %s3161_s5 = inlined_call_operand.hbm [shape: f32[32,256], index: 5, kind: output, shape index: {}]  }
   0x1   :  { %11 = vsyncpa [#allocation4], 0  ;;  %s18_s20 = sshll.u32 %s3157_s1, 4  ;;  %s2650_s21 = smov [#allocation2]   ;;  %s19_s20 = int_to_ptr.hbm [resolvable:$true] %s18_s20 }
   0x2   :  { %s20_s22 = sshll.u32 %s2650_s21, 4  ;;  %s2651_s23 = smov 64   ;;  %s21_s22 = int_to_ptr.vmem [resolvable:$true] %s20_s22 }
   0x3   :  { %s2652_s24 = smov 4  }
   0x4   :  { %26 = dma.hbm_to_vmem [thread:$0]  %s19_s20, 8192, %s21_s22, [#allocation3], %s2651_s23, %s2651_s23, %s2652_s24  }
   0x5   :  { %2646 = dma.done.wait [#allocation3], 8192  }
   0x6   :  { %2647 = vsyncadd [#allocation3], 4294959104  ;;  %v303_v0 = vlaneseq  ;;  %v38_v3 = vld [vmem:[%s3156_s0] sm:$0xff]   ;;  %v41_v19 = vld [vmem:[%s3156_s0 + $0x8] sm:$0xff]   ;;  %vm1230_vm0 = vcmask 662528   ;;  %vm1802_vm1 = vcmask 1041409  }
   0x7   :  { %v42_v4 = vunpack.c.l.bf16 %v38_v3  ;;  %v2705_v15 = vunpack.c.h.bf16 %v38_v3  ;;  %v2719_v21 = vunpack.c.h.bf16 %v41_v19  ;;  %v2732_v28 = vunpack.c.l.bf16 %v41_v19  ;;  %v2149_v56 = vld [vmem:[#allocation2 + $0x20] sm:$0xff]   ;;  %v2151_v57 = vld [vmem:[#allocation2 + $0x30] sm:$0xff]   ;;  %s1855_s21 = sshll.u32 %s3161_s5, 4  ;;  %s2656_s22 = smov 256   ;;  %s1856_s21 = int_to_ptr.hbm [resolvable:$true] %s1855_s21 }
   0x8   :  { %v2691_v1 = vshrl.u32 %v303_v0, 7  ;;  %v1908_v60 = vunpack.c.l.bf16 %v2149_v56  ;;  %v1916_v61 = vunpack.c.l.bf16 %v2151_v57  ;;  %v1909_v63 = vunpack.c.h.bf16 %v2149_v56  ;;  %s2657_s23 = smov 16  }
   0x9   :  { %v302_v5 = vperm.slane %v42_v4, 0  ;;  %v327_v6 = vperm.slane %v42_v4, 1  ;;  %v352_v7 = vperm.slane %v42_v4, 2  ;;  %v377_v8 = vperm.slane %v42_v4, 3 }
   0xa   :  { %2219 = vset.pattern.permute.xlu0 %v2691_v1  ;;  %v2695_v2 = vadd.s32 16, %v2691_v1  ;;  %2225 = vset.pattern.permute.xlu2 %v2691_v1  ;;  %v402_v11 = vperm.slane %v42_v4, 4  ;;  %v427_v12 = vperm.slane %v42_v4, 5  ;;  %v2703_v13 = vadd.s32 24, %v2691_v1 }
   0xb   :  { %v2232_v9 = vpack.i.bf16 %v327_v6, %v302_v5  ;;  %v2226_v10 = vpack.i.bf16 %v377_v8, %v352_v7  ;;  %v2708_v16 = vadd.s32 8, %v2691_v1  ;;  %v652_v17 = vperm.slane %v2705_v15, 6  ;;  %v1891_v6 = vld [vmem:[#allocation2] sm:$0xff]  }
   0xc   :  { %2231 = vset.pattern.permute.xlu1 %v2695_v2  ;;  %v2261_v14 = vpack.i.bf16 %v427_v12, %v402_v11  ;;  %v677_v18 = vperm.slane %v2705_v15, 7  ;;  %v902_v22 = vperm.slane %v2719_v21, 0  ;;  %v927_v23 = vperm.slane %v2719_v21, 1  ;;  %v2788_v12 = vld [vmem:[#allocation2 + $0x8] sm:$0xff]  }
   0xd   :  { %v452_v25 = vperm.slane %v42_v4, 6  ;;  %v477_v26 = vperm.slane %v42_v4, 7  ;;  %v702_v29 = vperm.slane %v2732_v28, 0  ;;  %v727_v30 = vperm.slane %v2732_v28, 1 }
   0xe   :  { %v2717_v20 = vpack.i.bf16 %v677_v18, %v652_v17  ;;  %v2724_v24 = vpack.i.bf16 %v927_v23, %v902_v22  ;;  %v952_v32 = vperm.slane %v2719_v21, 2  ;;  %v977_v33 = vperm.slane %v2719_v21, 3 }
   0xf   :  { %v2474_v27 = vpack.i.bf16 %v477_v26, %v452_v25  ;;  %v2736_v31 = vpack.i.bf16 %v727_v30, %v702_v29  ;;  %v502_v35 = vperm.slane %v2705_v15, 0  ;;  %v527_v36 = vperm.slane %v2705_v15, 1 }
  0x10   :  { %v2743_v34 = vpack.i.bf16 %v977_v33, %v952_v32  ;;  %v752_v38 = vperm.slane %v2732_v28, 2  ;;  %v777_v39 = vperm.slane %v2732_v28, 3  ;;  %v1002_v41 = vperm.slane %v2719_v21, 4 }
  0x11   :  { %v2514_v37 = vpack.i.bf16 %v527_v36, %v502_v35  ;;  %v1027_v42 = vperm.slane %v2719_v21, 5  ;;  %v552_v44 = vperm.slane %v2705_v15, 2  ;;  %v577_v45 = vperm.slane %v2705_v15, 3  ;;  %v2153_v36 = vld [vmem:[#allocation2 + $0x40] sm:$0xff]  }
  0x12   :  { %2221 = vperm.xlu0 %2219, %v2232_v9   ;;  %2227 = vperm.xlu2 %2225, %v2226_v10   ;;  %v2753_v40 = vpack.i.bf16 %v777_v39, %v752_v38  ;;  %v602_v50 = vperm.slane %v2705_v15, 4  ;;  %v627_v51 = vperm.slane %v2705_v15, 5  ;;  %v1917_v3 = vunpack.c.h.bf16 %v2151_v57 }
  0x13   :  { %v2760_v43 = vpack.i.bf16 %v1027_v42, %v1002_v41  ;;  %v2554_v46 = vpack.i.bf16 %v577_v45, %v552_v44  ;;  %v1893_v22 = vunpack.c.h.bf16 %v1891_v6  ;;  %v1896_v32 = vunpack.c.l.bf16 %v2788_v12  ;;  %v2804_v42 = vld [vmem:[#allocation2 + $0x50] sm:$0xff]  }
  0x14   :  { %2233 = vperm.xlu1 %2231, %v2232_v9   ;;  %v2339_v54 = vpack.i.bf16 %v627_v51, %v602_v50  ;;  %v2152_v50 = vld [vmem:[#allocation2 + $0x38] sm:$0xff]   ;;  %v1924_v57 = vunpack.c.l.bf16 %v2153_v36  ;;  %vm1804_vm2 = vcmask 1042434   ;;  %vm1806_vm3 = vcmask 1043459  }
  0x15   :  { %vm1808_vm4 = vcmask 1044484   ;;  %vm1810_vm5 = vcmask 1045509   ;;  %vm1812_vm6 = vcmask 1046534   ;;  %vm1814_vm7 = vcmask 1047559  }
  0x16   :  { %vm1673_vm8 = vcmask 261120  }
  0x1a   :  { %2262 = vperm.xlu0 %2219, %v2261_v14   ;;  %2243 = vset.pattern.permute.xlu2 %v2708_v16 }
  0x1c   :  { %2237 = vset.pattern.permute.xlu1 %v2703_v13 }
  0x22   :  { %2363 = vperm.xlu0 %2219, %v2717_v20   ;;  %2245 = vperm.xlu2 %2243, %v2226_v10  }
  0x24   :  { %2239 = vperm.xlu1 %2237, %v2232_v9  }
  0x2a   :  { %2464 = vperm.xlu0 %2219, %v2724_v24   ;;  %2255 = vset.pattern.permute.xlu2 %v2703_v13 }
  0x2c   :  { %2249 = vset.pattern.permute.xlu1 %v2695_v2 }
  0x32   :  { %2468 = vset.pattern.permute.xlu0 %v2708_v16  ;;  %2257 = vperm.xlu2 %2255, %v2226_v10  }
  0x34   :  { %2251 = vperm.xlu1 %2249, %v2226_v10   ;;  %v2147_v10 = vld [vmem:[#allocation2 + $0x10] sm:$0xff]  }
  0x35   :  { %v1900_v25 = vunpack.c.l.bf16 %v2147_v10 }
  0x3a   :  { %2470 = vperm.xlu0 %2468, %v2232_v9   ;;  %2272 = vset.pattern.permute.xlu2 %v2695_v2  ;;  %v1892_v9 = vunpack.c.l.bf16 %v1891_v6 }
  0x3c   :  { %2266 = vset.pattern.permute.xlu1 %v2708_v16 }
  0x42   :  { %2475 = vperm.xlu0 %2468, %v2474_v27   ;;  %2274 = vperm.xlu2 %2272, %v2261_v14  }
  0x44   :  { %2268 = vperm.xlu1 %2266, %v2261_v14  }
  0x4a   :  { %2480 = vperm.xlu0 %2468, %v2736_v31   ;;  %2284 = vset.pattern.permute.xlu2 %v2691_v1 }
  0x4c   :  { %2278 = vset.pattern.permute.xlu1 %v2703_v13 }
  0x52   :  { %2509 = vperm.xlu0 %2468, %v2743_v34   ;;  %2286 = vperm.xlu2 %2284, %v2474_v27  }
  0x54   :  { %2280 = vperm.xlu1 %2278, %v2261_v14   ;;  %v2790_v14 = vld [vmem:[#allocation2 + $0x18] sm:$0xff]  }
  0x55   :  { %v1904_v33 = vunpack.c.l.bf16 %v2790_v14  ;;  %v1905_v56 = vunpack.c.h.bf16 %v2790_v14 }
  0x5a   :  { %2513 = vset.pattern.permute.xlu0 %v2695_v2  ;;  %2296 = vset.pattern.permute.xlu2 %v2703_v13 }
  0x5c   :  { %2290 = vset.pattern.permute.xlu1 %v2695_v2 }
  0x62   :  { %2515 = vperm.xlu0 %2513, %v2514_v37   ;;  %2298 = vperm.xlu2 %2296, %v2474_v27  }
  0x64   :  { %2292 = vperm.xlu1 %2290, %v2474_v27   ;;  %v1901_v27 = vunpack.c.h.bf16 %v2147_v10 }
  0x6a   :  { %2520 = vperm.xlu0 %2513, %v2753_v40   ;;  %2308 = vset.pattern.permute.xlu2 %v2708_v16 }
  0x6c   :  { %2302 = vset.pattern.permute.xlu1 %v2691_v1  ;;  %v2228_v52 = vpop.permute.xlu2 %2227 }
  0x6d   :  { %v2230_v62 = vunpack.i.h.bf16 %v2228_v52  ;;  %v2229_v0 = vunpack.i.l.bf16 %v2228_v52 }
  0x6f   :  { %v1114_v8 = vmul.f32 %v2230_v62, %v1916_v61  ;;  %v1110_v11 = vmul.f32 %v2229_v0, %v1908_v60  ;;  %v1932_v62 = vunpack.c.l.bf16 %v2804_v42 }
  0x71   :  { %v1270_v30 = vsel %vm1230_vm0, %v1114_v8, 0.0 }
  0x72   :  { %2549 = vperm.xlu0 %2513, %v2760_v43   ;;  %2310 = vperm.xlu2 %2308, %v2514_v37  }
  0x74   :  { %2304 = vperm.xlu1 %2302, %v2514_v37  }
  0x7a   :  { %2553 = vset.pattern.permute.xlu0 %v2703_v13  ;;  %2320 = vset.pattern.permute.xlu2 %v2691_v1 }
  0x7c   :  { %2314 = vset.pattern.permute.xlu1 %v2703_v13  ;;  %v2246_v59 = vpop.permute.xlu2 %2245 }
  0x7d   :  { %v2248_v4 = vunpack.i.h.bf16 %v2246_v59  ;;  %v2247_v5 = vunpack.i.l.bf16 %v2246_v59 }
  0x7f   :  { %v1115_v15 = vmul.f32 %v2248_v4, %v1917_v3  ;;  %v1111_v17 = vmul.f32 %v2247_v5, %v1909_v63  ;;  %v1920_v3 = vunpack.c.l.bf16 %v2152_v50 }
  0x81   :  { %v1271_v39 = vsel %vm1230_vm0, %v1115_v15, 0.0  ;;  %v1258_v41 = vsel %vm1230_vm0, %v1111_v17, 0.0  ;;  %v1925_v17 = vunpack.c.h.bf16 %v2153_v36 }
  0x82   :  { %2555 = vperm.xlu0 %2553, %v2554_v46   ;;  %2322 = vperm.xlu2 %2320, %v2554_v46   ;;  %v2808_v61 = vadd.f32 %v1271_v39, %v1270_v30 }
  0x84   :  { %2316 = vperm.xlu1 %2314, %v2514_v37   ;;  %v2768_v47 = vpop.permute.xlu0 %2221  ;;  %v1257_v37 = vsel %vm1230_vm0, %v1110_v11, 0.0 }
  0x85   :  { %v2223_v19 = vunpack.i.l.bf16 %v2768_v47  ;;  %v2224_v26 = vunpack.i.h.bf16 %v2768_v47  ;;  %v2150_v47 = vld [vmem:[#allocation2 + $0x28] sm:$0xff]   ;;  %v1259_v60 = vadd.f32 %v1258_v41, %v1257_v37  ;;  %v1933_v37 = vunpack.c.h.bf16 %v2804_v42 }
  0x86   :  { %v2780_v53 = vpop.permute.xlu1 %2233  ;;  %v1912_v0 = vunpack.c.l.bf16 %v2150_v47  ;;  %v1913_v4 = vunpack.c.h.bf16 %v2150_v47 }
  0x87   :  { %v2236_v35 = vunpack.i.h.bf16 %v2780_v53  ;;  %v2235_v38 = vunpack.i.l.bf16 %v2780_v53  ;;  %v1102_v45 = vmul.f32 %v2223_v19, %v1892_v9  ;;  %v1106_v52 = vmul.f32 %v2224_v26, %v1900_v25 }
  0x89   :  { %v1108_v59 = vmul.f32 %v2236_v35, %v1904_v33  ;;  %v1104_v63 = vmul.f32 %v2235_v38, %v1896_v32  ;;  %v1231_v6 = vsel %vm1230_vm0, %v1102_v45, 0.0  ;;  %v1244_v9 = vsel %vm1230_vm0, %v1106_v52, 0.0 }
  0x8a   :  { %2332 = vset.pattern.permute.xlu2 %v2695_v2 }
  0x8b   :  { %v1247_v14 = vsel %vm1230_vm0, %v1108_v59, 0.0 }
  0x8c   :  { %2326 = vset.pattern.permute.xlu1 %v2708_v16  ;;  %v2772_v48 = vpop.permute.xlu0 %2262  ;;  %v2258_v44 = vpop.permute.xlu2 %2257 }
  0x8d   :  { %v2265_v10 = vunpack.i.h.bf16 %v2772_v48  ;;  %v2264_v11 = vunpack.i.l.bf16 %v2772_v48  ;;  %v2260_v30 = vunpack.i.h.bf16 %v2258_v44  ;;  %v2259_v32 = vunpack.i.l.bf16 %v2258_v44 }
  0x8f   :  { %v1122_v35 = vmul.f32 %v2265_v10, %v1932_v62  ;;  %v1118_v36 = vmul.f32 %v2264_v11, %v1924_v57 }
  0x91   :  { %v1283_v42 = vsel %vm1230_vm0, %v1118_v36, 0.0  ;;  %v1296_v10 = vsel %vm1230_vm0, %v1122_v35, 0.0 }
  0x92   :  { %2334 = vperm.xlu2 %2332, %v2554_v46  }
  0x94   :  { %2328 = vperm.xlu1 %2326, %v2554_v46   ;;  %v2774_v49 = vpop.permute.xlu0 %2363  ;;  %v1897_v46 = vunpack.c.h.bf16 %v2788_v12 }
  0x96   :  { %v2784_v58 = vpop.permute.xlu1 %2239 }
  0x97   :  { %v2241_v15 = vunpack.i.l.bf16 %v2784_v58 }
  0x99   :  { %v1105_v39 = vmul.f32 %v2241_v15, %v1897_v46 }
  0x9a   :  { %2344 = vset.pattern.permute.xlu2 %v2708_v16 }
  0x9b   :  { %v1236_v57 = vsel %vm1230_vm0, %v1105_v39, 0.0 }
  0x9c   :  { %2338 = vset.pattern.permute.xlu1 %v2691_v1  ;;  %v2782_v55 = vpop.permute.xlu0 %2464 }
  0xa2   :  { %2346 = vperm.xlu2 %2344, %v2339_v54  }
  0xa4   :  { %2340 = vperm.xlu1 %2338, %v2339_v54  }
  0xa6   :  { %v2792_v18 = vpop.permute.xlu1 %2251 }
  0xa7   :  { %v2254_v25 = vunpack.i.h.bf16 %v2792_v18 }
  0xaa   :  { %2356 = vset.pattern.permute.xlu2 %v2703_v13 }
  0xac   :  { %2350 = vset.pattern.permute.xlu1 %v2695_v2  ;;  %v2471_v7 = vpop.permute.xlu0 %2470 }
  0xad   :  { %v2472_v23 = vunpack.i.l.bf16 %v2471_v7  ;;  %v2473_v29 = vunpack.i.h.bf16 %v2471_v7  ;;  %v1921_v7 = vunpack.c.h.bf16 %v2152_v50  ;;  %v1116_v50 = vmul.f32 %v2254_v25, %v1920_v3 }
  0xaf   :  { %v1103_v51 = vmul.f32 %v2472_v23, %v1893_v22  ;;  %v1107_v53 = vmul.f32 %v2473_v29, %v1901_v27  ;;  %v1234_v22 = vsel %vm1230_vm0, %v1104_v63, 0.0  ;;  %v2242_v23 = vunpack.i.h.bf16 %v2784_v58  ;;  %v2154_v27 = vld [vmem:[#allocation2 + $0x48] sm:$0xff]   ;;  %v2275_v29 = vpop.permute.xlu2 %2274 }
  0xb0   :  { %v1928_v41 = vunpack.c.l.bf16 %v2154_v27  ;;  %v2276_v45 = vunpack.i.l.bf16 %v2275_v29  ;;  %v1117_v59 = vmul.f32 %v2260_v30, %v1921_v7  ;;  %v2277_v62 = vunpack.i.h.bf16 %v2275_v29  ;;  %v2157_v29 = vld [vmem:[#allocation2 + $0x60] sm:$0xff]  }
  0xb1   :  { %v1232_v8 = vsel %vm1230_vm0, %v1103_v51, 0.0  ;;  %v1245_v12 = vsel %vm1230_vm0, %v1107_v53, 0.0  ;;  %v1109_v47 = vmul.f32 %v2242_v23, %v1905_v56  ;;  %v1113_v53 = vmul.f32 %v2259_v32, %v1913_v4 }
  0xb2   :  { %2358 = vperm.xlu2 %2356, %v2339_v54   ;;  %v1233_v26 = vadd.f32 %v1232_v8, %v1231_v6  ;;  %v1246_v33 = vadd.f32 %v1245_v12, %v1244_v9  ;;  %v1273_v56 = vsel %vm1230_vm0, %v1116_v50, 0.0  ;;  %v1929_v8 = vunpack.c.h.bf16 %v2154_v27 }
  0xb3   :  { %v1249_v6 = vsel %vm1230_vm0, %v1109_v47, 0.0  ;;  %v1262_v4 = vsel %vm1230_vm0, %v1113_v53, 0.0  ;;  %v1275_v25 = vsel %vm1230_vm0, %v1117_v59, 0.0  ;;  %v1940_v39 = vunpack.c.l.bf16 %v2157_v29 }
  0xb4   :  { %2352 = vperm.xlu1 %2350, %v2339_v54   ;;  %v2253_v54 = vunpack.i.l.bf16 %v2792_v18  ;;  %v2156_v18 = vld [vmem:[#allocation2 + $0x58] sm:$0xff]   ;;  %v1235_v51 = vadd.f32 %v1234_v22, %v1233_v26  ;;  %v1248_v44 = vadd.f32 %v1247_v14, %v1246_v33  ;;  %v1941_v59 = vunpack.c.h.bf16 %v2157_v29 }
  0xb5   :  { %v1937_v9 = vunpack.c.h.bf16 %v2156_v18 }
  0xb6   :  { %v2269_v5 = vpop.permute.xlu1 %2268  ;;  %v1112_v48 = vmul.f32 %v2253_v54, %v1912_v0  ;;  %v1936_v0 = vunpack.c.l.bf16 %v2156_v18  ;;  %v1237_v54 = vadd.f32 %v1236_v57, %v1235_v51  ;;  %v1250_v7 = vadd.f32 %v1249_v6, %v1248_v44 }
  0xb7   :  { %v2270_v19 = vunpack.i.l.bf16 %v2269_v5  ;;  %v2271_v38 = vunpack.i.h.bf16 %v2269_v5  ;;  %v1120_v5 = vmul.f32 %v2276_v45, %v1928_v41  ;;  %v2287_v23 = vpop.permute.xlu2 %2286  ;;  %v2476_v41 = vpop.permute.xlu0 %2475 }
  0xb8   :  { %v1260_v52 = vsel %vm1230_vm0, %v1112_v48, 0.0  ;;  %v1124_v14 = vmul.f32 %v2277_v62, %v1936_v0  ;;  %v1238_v27 = vrot.slane %v1237_v54, 4  ;;  %v2159_v48 = vld [vmem:[#allocation2 + $0x70] sm:$0xff]   ;;  %v1251_v30 = vrot.slane %v1250_v7, 4 }
  0xb9   :  { %v1119_v58 = vmul.f32 %v2270_v19, %v1925_v17  ;;  %v1123_v63 = vmul.f32 %v2271_v38, %v1933_v37  ;;  %v1261_v3 = vadd.f32 %v1260_v52, %v1259_v60  ;;  %v1274_v17 = vadd.f32 %v1273_v56, %v2808_v61 }
  0xba   :  { %2373 = vset.pattern.permute.xlu2 %v2695_v2  ;;  %v1286_v60 = vsel %vm1230_vm0, %v1120_v5, 0.0  ;;  %v1299_v36 = vsel %vm1230_vm0, %v1124_v14, 0.0  ;;  %v2289_v50 = vunpack.i.h.bf16 %v2287_v23  ;;  %v1239_v51 = vadd.f32 %v1238_v27, %v1237_v54 }
  0xbb   :  { %v1284_v46 = vsel %vm1230_vm0, %v1119_v58, 0.0  ;;  %v1297_v11 = vsel %vm1230_vm0, %v1123_v63, 0.0  ;;  %v1263_v26 = vadd.f32 %v1262_v4, %v1261_v3  ;;  %v1276_v38 = vadd.f32 %v1275_v25, %v1274_v17 }
  0xbc   :  { %2367 = vset.pattern.permute.xlu1 %v2708_v16  ;;  %v1285_v12 = vadd.f32 %v1284_v46, %v1283_v42  ;;  %v1298_v32 = vadd.f32 %v1297_v11, %v1296_v10  ;;  %v1948_v58 = vunpack.c.l.bf16 %v2159_v48  ;;  %v1252_v52 = vadd.f32 %v1251_v30, %v1250_v7  ;;  %v2158_v10 = vld [vmem:[#allocation2 + $0x68] sm:$0xff]  }
  0xbd   :  { %v1264_v18 = vrot.slane %v1263_v26, 4  ;;  %v2288_v44 = vunpack.i.l.bf16 %v2287_v23  ;;  %v1949_v63 = vunpack.c.h.bf16 %v2159_v48  ;;  %v2478_v0 = vunpack.i.h.bf16 %v2476_v41 }
  0xbe   :  { %v1287_v37 = vadd.f32 %v1286_v60, %v1285_v12  ;;  %v1300_v53 = vadd.f32 %v1299_v36, %v1298_v32  ;;  %v2477_v62 = vunpack.i.l.bf16 %v2476_v41  ;;  %v1277_v57 = vrot.slane %v1276_v38, 4 }
  0xbf   :  { %v2299_v46 = vpop.permute.xlu2 %2298  ;;  %v1265_v5 = vadd.f32 %v1264_v18, %v1263_v26  ;;  %v1130_v56 = vmul.f32 %v2289_v50, %v1948_v58  ;;  %v1240_v3 = vrot.slane %v1239_v51, 2  ;;  %v1253_v4 = vrot.slane %v1252_v52, 2 }
  0xc0   :  { %v1131_v54 = vmul.f32 %v2478_v0, %v1949_v63  ;;  %v1127_v7 = vmul.f32 %v2477_v62, %v1941_v59  ;;  %v2301_v12 = vunpack.i.h.bf16 %v2299_v46  ;;  %v2300_v17 = vunpack.i.l.bf16 %v2299_v46 }
  0xc1   :  { %v1266_v60 = vrot.slane %v1265_v5, 2  ;;  %v1322_v23 = vsel %vm1230_vm0, %v1130_v56, 0.0  ;;  %v1241_v25 = vadd.f32 %v1240_v3, %v1239_v51  ;;  %v1254_v26 = vadd.f32 %v1253_v4, %v1252_v52 }
  0xc2   :  { %2375 = vperm.xlu2 %2373, %v2717_v20   ;;  %v1944_v27 = vunpack.c.l.bf16 %v2158_v10  ;;  %v1323_v30 = vsel %vm1230_vm0, %v1131_v54, 0.0  ;;  %v1310_v32 = vsel %vm1230_vm0, %v1127_v7, 0.0 }
  0xc3   :  { %v1242_v58 = vrot.slane %v1241_v25, 1  ;;  %v1255_v41 = vrot.slane %v1254_v26, 1  ;;  %v1324_v50 = vadd.f32 %v1323_v30, %v1322_v23 }
  0xc4   :  { %2369 = vperm.xlu1 %2367, %v2717_v20  }
  0xc5   :  { %v1243_v46 = vadd.f32 %v1242_v58, %v1241_v25 }
  0xc6   :  { %v2281_v15 = vpop.permute.xlu1 %2280 }
  0xc7   :  { %v2283_v19 = vunpack.i.h.bf16 %v2281_v15  ;;  %v2282_v22 = vunpack.i.l.bf16 %v2281_v15  ;;  %v1945_v15 = vunpack.c.h.bf16 %v2158_v10 }
  0xc9   :  { %v1125_v33 = vmul.f32 %v2283_v19, %v1937_v9  ;;  %v1121_v35 = vmul.f32 %v2282_v22, %v1929_v8  ;;  %v1126_v8 = vmul.f32 %v2288_v44, %v1940_v39  ;;  %v2160_v9 = vld [vmem:[#allocation2 + $0x78] sm:$0xff]   ;;  %v1278_v19 = vadd.f32 %v1277_v57, %v1276_v38 }
  0xca   :  { %2385 = vset.pattern.permute.xlu2 %v2691_v1  ;;  %v1953_v11 = vunpack.c.h.bf16 %v2160_v9  ;;  %v1952_v29 = vunpack.c.l.bf16 %v2160_v9 }
  0xcb   :  { %v1288_v61 = vsel %vm1230_vm0, %v1121_v35, 0.0  ;;  %v1301_v45 = vsel %vm1230_vm0, %v1125_v33, 0.0  ;;  %v1309_v48 = vsel %vm1230_vm0, %v1126_v8, 0.0  ;;  %v1279_v39 = vrot.slane %v1278_v19, 2 }
  0xcc   :  { %v1289_v47 = vadd.f32 %v1288_v61, %v1287_v37  ;;  %2379 = vset.pattern.permute.xlu1 %v2703_v13  ;;  %v1302_v42 = vadd.f32 %v1301_v45, %v1300_v53  ;;  %v1133_v35 = vmul.f32 %v2301_v12, %v1953_v11  ;;  %v1129_v61 = vmul.f32 %v2300_v17, %v1945_v15 }
  0xcd   :  { %v1311_v51 = vadd.f32 %v1310_v32, %v1309_v48 }
  0xce   :  { %v1290_v6 = vrot.slane %v1289_v47, 4  ;;  %v1303_v14 = vrot.slane %v1302_v42, 4  ;;  %v1327_v52 = vsel %vm1230_vm0, %v1133_v35, 0.0  ;;  %v1314_v63 = vsel %vm1230_vm0, %v1129_v61, 0.0 }
  0xcf   :  { %v827_v61 = vperm.slane %v2732_v28, 5 }
  0xd0   :  { %v1291_v22 = vadd.f32 %v1290_v6, %v1289_v47  ;;  %v1304_v36 = vadd.f32 %v1303_v14, %v1302_v42  ;;  %v1267_v47 = vadd.f32 %v1266_v60, %v1265_v5  ;;  %v1280_v42 = vadd.f32 %v1279_v39, %v1278_v19  ;;  %v2872_v39 = vpop.permute.xlu0 %2480 }
  0xd1   :  { %v1256_v6 = vadd.f32 %v1255_v41, %v1254_v26 }
  0xd2   :  { %2387 = vperm.xlu2 %2385, %v2736_v31   ;;  %v1305_v53 = vrot.slane %v1304_v36, 2  ;;  %v1268_v5 = vrot.slane %v1267_v47, 1  ;;  %v1281_v7 = vrot.slane %v1280_v42, 1 }
  0xd3   :  { %v1803_v10 = vsel %vm1802_vm1, %v1256_v6, %v1243_v46 }
  0xd4   :  { %2381 = vperm.xlu1 %2379, %v2717_v20   ;;  %v1292_v20 = vrot.slane %v1291_v22, 2  ;;  %v1306_v4 = vadd.f32 %v1305_v53, %v1304_v36  ;;  %v1269_v11 = vadd.f32 %v1268_v5, %v1267_v47  ;;  %v1282_v23 = vadd.f32 %v1281_v7, %v1280_v42  ;;  %v2888_v42 = vld [vmem:[#allocation2 + $0x98] sm:$0xff]  }
  0xd6   :  { %v2293_v33 = vpop.permute.xlu1 %2292  ;;  %v1293_v0 = vadd.f32 %v1292_v20, %v1291_v22  ;;  %v1307_v15 = vrot.slane %v1306_v4, 1  ;;  %v1805_v60 = vsel %vm1804_vm2, %v1269_v11, %v1803_v10 }
  0xd7   :  { %v2295_v37 = vunpack.i.h.bf16 %v2293_v33  ;;  %v2294_v38 = vunpack.i.l.bf16 %v2293_v33 }
  0xd8   :  { %v1294_v8 = vrot.slane %v1293_v0, 1  ;;  %v2877_v58 = vpop.permute.xlu0 %2509 }
  0xd9   :  { %v1132_v18 = vmul.f32 %v2295_v37, %v1952_v29  ;;  %v1128_v45 = vmul.f32 %v2294_v38, %v1944_v27  ;;  %v1308_v27 = vadd.f32 %v1307_v15, %v1306_v4  ;;  %v1807_v29 = vsel %vm1806_vm3, %v1282_v23, %v1805_v60  ;;  %v2165_v4 = vld [vmem:[#allocation2 + $0xa0] sm:$0xff]  }
  0xda   :  { %2397 = vset.pattern.permute.xlu2 %v2703_v13  ;;  %v1295_v17 = vadd.f32 %v1294_v8, %v1293_v0  ;;  %v802_v38 = vperm.slane %v2732_v28, 4  ;;  %v2894_v8 = vld [vmem:[#allocation2 + $0xb0] sm:$0xff]   ;;  %v877_v60 = vperm.slane %v2732_v28, 7 }
  0xdb   :  { %v1325_v44 = vsel %vm1230_vm0, %v1132_v18, 0.0  ;;  %v1312_v59 = vsel %vm1230_vm0, %v1128_v45, 0.0  ;;  %v2311_v45 = vpop.permute.xlu2 %2310 }
  0xdc   :  { %v1313_v62 = vadd.f32 %v1312_v59, %v1311_v51  ;;  %v1326_v57 = vadd.f32 %v1325_v44, %v1324_v50  ;;  %2391 = vset.pattern.permute.xlu1 %v2695_v2  ;;  %v1809_v48 = vsel %vm1808_vm4, %v1295_v17, %v1807_v29  ;;  %v2559_v20 = vpack.i.bf16 %v827_v61, %v802_v38  ;;  %v2161_v51 = vld [vmem:[#allocation2 + $0x80] sm:$0xff]  }
  0xdd   :  { %v1811_v36 = vsel %vm1810_vm5, %v1308_v27, %v1809_v48  ;;  %v1957_v44 = vunpack.c.h.bf16 %v2161_v51  ;;  %v1956_v46 = vunpack.c.l.bf16 %v2161_v51  ;;  %v852_v17 = vperm.slane %v2732_v28, 6 }
  0xde   :  { %v1315_v56 = vadd.f32 %v1314_v63, %v1313_v62  ;;  %v1328_v3 = vadd.f32 %v1327_v52, %v1326_v57  ;;  %2560 = vperm.xlu0 %2553, %v2559_v20   ;;  %v2163_v52 = vld [vmem:[#allocation2 + $0x90] sm:$0xff]   ;;  %v2312_v63 = vunpack.i.l.bf16 %v2311_v45  ;;  %v2886_v57 = vld [vmem:[#allocation2 + $0x88] sm:$0xff]  }
  0xdf   :  { %v1965_v59 = vunpack.c.h.bf16 %v2163_v52  ;;  %v1964_v0 = vunpack.c.l.bf16 %v2163_v52  ;;  %v1973_v52 = vunpack.c.h.bf16 %v2165_v4 }
  0xe0   :  { %v1316_v9 = vrot.slane %v1315_v56, 4  ;;  %v1329_v54 = vrot.slane %v1328_v3, 4  ;;  %v2516_v18 = vpop.permute.xlu0 %2515 }
  0xe1   :  { %v2518_v10 = vunpack.i.h.bf16 %v2516_v18 }
  0xe2   :  { %v1317_v12 = vadd.f32 %v1316_v9, %v1315_v56  ;;  %v1330_v14 = vadd.f32 %v1329_v54, %v1328_v3  ;;  %2399 = vperm.xlu2 %2397, %v2736_v31   ;;  %v1960_v56 = vunpack.c.l.bf16 %v2886_v57  ;;  %v1968_v3 = vunpack.c.l.bf16 %v2888_v42 }
  0xe3   :  { %v2323_v53 = vpop.permute.xlu2 %2322  ;;  %v1135_v54 = vmul.f32 %v2312_v63, %v1957_v44  ;;  %v1969_v63 = vunpack.c.h.bf16 %v2888_v42 }
  0xe4   :  { %v1318_v19 = vrot.slane %v1317_v12, 2  ;;  %v1331_v22 = vrot.slane %v1330_v14, 2  ;;  %2393 = vperm.xlu1 %2391, %v2736_v31   ;;  %v2325_v23 = vunpack.i.h.bf16 %v2323_v53  ;;  %v1140_v48 = vmul.f32 %v2518_v10, %v1968_v3 }
  0xe6   :  { %v1319_v25 = vadd.f32 %v1318_v19, %v1317_v12  ;;  %v1332_v26 = vadd.f32 %v1331_v22, %v1330_v14  ;;  %v2305_v41 = vpop.permute.xlu1 %2304  ;;  %v2517_v14 = vunpack.i.l.bf16 %v2516_v18  ;;  %v1972_v19 = vunpack.c.l.bf16 %v2165_v4 }
  0xe7   :  { %v2307_v62 = vunpack.i.h.bf16 %v2305_v41  ;;  %v2306_v6 = vunpack.i.l.bf16 %v2305_v41  ;;  %v1980_v22 = vunpack.c.l.bf16 %v2894_v8  ;;  %v1351_v51 = vsel %vm1230_vm0, %v1140_v48, 0.0 }
  0xe8   :  { %v1320_v30 = vrot.slane %v1319_v25, 1  ;;  %v1333_v32 = vrot.slane %v1332_v26, 1  ;;  %v2884_v50 = vpop.permute.xlu0 %2520 }
  0xe9   :  { %v1138_v7 = vmul.f32 %v2307_v62, %v1964_v0  ;;  %v1134_v12 = vmul.f32 %v2306_v6, %v1956_v46  ;;  %v1981_v46 = vunpack.c.h.bf16 %v2894_v8 }
  0xea   :  { %v1321_v33 = vadd.f32 %v1320_v30, %v1319_v25  ;;  %v1334_v35 = vadd.f32 %v1333_v32, %v1332_v26  ;;  %2409 = vset.pattern.permute.xlu2 %v2708_v16  ;;  %v2324_v25 = vunpack.i.l.bf16 %v2323_v53  ;;  %v2903_v26 = vld [vmem:[#allocation2 + $0xa8] sm:$0xff]   ;;  %v2907_v30 = vld [vmem:[#allocation2 + $0xb8] sm:$0xff]   ;;  %v1336_v32 = vsel %vm1230_vm0, %v1135_v54, 0.0 }
  0xeb   :  { %v1348_v29 = vsel %vm1230_vm0, %v1138_v7, 0.0  ;;  %v1335_v28 = vsel %vm1230_vm0, %v1134_v12, 0.0  ;;  %v1976_v38 = vunpack.c.l.bf16 %v2903_v26  ;;  %v1977_v42 = vunpack.c.h.bf16 %v2903_v26  ;;  %v2171_v12 = vld [vmem:[#allocation2 + $0xd0] sm:$0xff]  }
  0xec   :  { %v1813_v37 = vsel %vm1812_vm6, %v1321_v33, %v1811_v36  ;;  %2403 = vset.pattern.permute.xlu1 %v2691_v1  ;;  %v2335_v15 = vpop.permute.xlu2 %2334  ;;  %v1136_v33 = vmul.f32 %v2517_v14, %v1960_v56  ;;  %v2913_v36 = vpack.i.bf16 %v877_v60, %v852_v17  ;;  %v1985_v8 = vunpack.c.h.bf16 %v2907_v30  ;;  %v2170_v60 = vld [vmem:[#allocation2 + $0xc8] sm:$0xff]  }
  0xed   :  { %v1815_v31 = vsel %vm1814_vm7, %v1334_v35, %v1813_v37  ;;  %v1146_v37 = vmul.f32 %v2325_v23, %v1980_v22  ;;  %v2337_v41 = vunpack.i.h.bf16 %v2335_v15  ;;  %v2336_v18 = vunpack.i.l.bf16 %v2335_v15 }
  0xee   :  { %1841 = vst.msk [vmem:[#allocation5] sm:$0xff] %vm1230_vm0, %v1815_v31  ;;  %v1142_v31 = vmul.f32 %v2324_v25, %v1972_v19  ;;  %v1338_v44 = vsel %vm1230_vm0, %v1136_v33, 0.0  ;;  %v1997_v26 = vunpack.c.h.bf16 %v2171_v12 }
  0xef   :  { %v1374_v0 = vsel %vm1230_vm0, %v1146_v37, 0.0 }
  0xf0   :  { %v2896_v11 = vpop.permute.xlu0 %2549  ;;  %v1361_v62 = vsel %vm1230_vm0, %v1142_v31, 0.0 }
  0xf2   :  { %2411 = vperm.xlu2 %2409, %v2753_v40  }
  0xf4   :  { %2405 = vperm.xlu1 %2403, %v2753_v40  }
  0xf6   :  { %v2882_v47 = vpop.permute.xlu1 %2316 }
  0xf7   :  { %v2319_v7 = vunpack.i.h.bf16 %v2882_v47  ;;  %v2318_v14 = vunpack.i.l.bf16 %v2882_v47 }
  0xf8   :  { %v2556_v6 = vpop.permute.xlu0 %2555 }
  0xf9   :  { %v2558_v15 = vunpack.i.h.bf16 %v2556_v6  ;;  %v2557_v17 = vunpack.i.l.bf16 %v2556_v6 }
  0xfa   :  { %2421 = vset.pattern.permute.xlu2 %v2691_v1 }
  0xfc   :  { %2415 = vset.pattern.permute.xlu1 %v2703_v13 }
 0x102   :  { %2423 = vperm.xlu2 %2421, %v2559_v20  }
 0x104   :  { %2417 = vperm.xlu1 %2415, %v2753_v40   ;;  %v2313_v40 = vunpack.i.h.bf16 %v2311_v45  ;;  %v1337_v45 = vadd.f32 %v1336_v32, %v1335_v28  ;;  %v1141_v32 = vmul.f32 %v2319_v7, %v1969_v63  ;;  %v1992_v28 = vunpack.c.l.bf16 %v2170_v60 }
 0x106   :  { %v2890_v5 = vpop.permute.xlu1 %2328  ;;  %v1139_v9 = vmul.f32 %v2313_v40, %v1965_v59  ;;  %v1961_v59 = vunpack.c.h.bf16 %v2886_v57  ;;  %v2347_v40 = vpop.permute.xlu2 %2346  ;;  %v2169_v57 = vld [vmem:[#allocation2 + $0xc0] sm:$0xff]   ;;  %v1339_v54 = vadd.f32 %v1338_v44, %v1337_v45 }
 0x107   :  { %v2330_v53 = vunpack.i.l.bf16 %v2890_v5  ;;  %v2331_v3 = vunpack.i.h.bf16 %v2890_v5  ;;  %v1989_v22 = vunpack.c.h.bf16 %v2169_v57  ;;  %v2348_v5 = vunpack.i.l.bf16 %v2347_v40 }
 0x108   :  { %v1349_v27 = vsel %vm1230_vm0, %v1139_v9, 0.0  ;;  %v1144_v9 = vmul.f32 %v2336_v18, %v1976_v38  ;;  %v1988_v23 = vunpack.c.l.bf16 %v2169_v57  ;;  %v1137_v37 = vmul.f32 %v2318_v14, %v1961_v59 }
 0x109   :  { %v1350_v61 = vadd.f32 %v1349_v27, %v1348_v29  ;;  %v1143_v10 = vmul.f32 %v2330_v53, %v1973_v52  ;;  %v1147_v27 = vmul.f32 %v2331_v3, %v1981_v46  ;;  %v2349_v31 = vunpack.i.h.bf16 %v2347_v40 }
 0x10a   :  { %2433 = vset.pattern.permute.xlu2 %v2695_v2  ;;  %v1364_v48 = vsel %vm1230_vm0, %v1144_v9, 0.0  ;;  %v1996_v38 = vunpack.c.l.bf16 %v2171_v12  ;;  %v1145_v18 = vmul.f32 %v2557_v17, %v1977_v42  ;;  %v1151_v45 = vmul.f32 %v2348_v5, %v1989_v22  ;;  %v2173_v5 = vld [vmem:[#allocation2 + $0xe0] sm:$0xff]  }
 0x10b   :  { %v1352_v56 = vadd.f32 %v1351_v51, %v1350_v61  ;;  %v1362_v47 = vsel %vm1230_vm0, %v1143_v10, 0.0  ;;  %v1375_v52 = vsel %vm1230_vm0, %v1147_v27, 0.0  ;;  %v1353_v59 = vsel %vm1230_vm0, %v1141_v32, 0.0 }
 0x10c   :  { %2427 = vset.pattern.permute.xlu1 %v2708_v16  ;;  %v1363_v53 = vadd.f32 %v1362_v47, %v1361_v62  ;;  %v1993_v46 = vunpack.c.h.bf16 %v2170_v60  ;;  %v1155_v3 = vmul.f32 %v2349_v31, %v1997_v26  ;;  %v1376_v9 = vadd.f32 %v1375_v52, %v1374_v0 }
 0x10d   :  { %v1388_v57 = vsel %vm1230_vm0, %v1151_v45, 0.0  ;;  %v1354_v60 = vadd.f32 %v1353_v59, %v1352_v56  ;;  %v2005_v45 = vunpack.c.h.bf16 %v2173_v5 }
 0x10e   :  { %v1365_v10 = vadd.f32 %v1364_v48, %v1363_v53 }
 0x112   :  { %2435 = vperm.xlu2 %2433, %v2559_v20  }
 0x114   :  { %2429 = vperm.xlu1 %2427, %v2559_v20   ;;  %v1984_v20 = vunpack.c.l.bf16 %v2907_v30  ;;  %v2172_v30 = vld [vmem:[#allocation2 + $0xd8] sm:$0xff]  }
 0x115   :  { %v2000_v44 = vunpack.c.l.bf16 %v2172_v30  ;;  %v2001_v12 = vunpack.c.h.bf16 %v2172_v30 }
 0x116   :  { %v2911_v35 = vpop.permute.xlu1 %2340  ;;  %v1148_v4 = vmul.f32 %v2337_v41, %v1984_v20  ;;  %v2359_v20 = vpop.permute.xlu2 %2358  ;;  %v1149_v41 = vmul.f32 %v2558_v15, %v1985_v8  ;;  %v1366_v8 = vsel %vm1230_vm0, %v1145_v18, 0.0 }
 0x117   :  { %v2342_v25 = vunpack.i.l.bf16 %v2911_v35  ;;  %v2343_v61 = vunpack.i.h.bf16 %v2911_v35  ;;  %v2360_v6 = vunpack.i.l.bf16 %v2359_v20  ;;  %v1340_v35 = vsel %vm1230_vm0, %v1137_v37, 0.0 }
 0x118   :  { %v1377_v29 = vsel %vm1230_vm0, %v1148_v4, 0.0  ;;  %v2361_v62 = vunpack.i.h.bf16 %v2359_v20  ;;  %v1341_v14 = vadd.f32 %v1340_v35, %v1339_v54  ;;  %v1379_v27 = vsel %vm1230_vm0, %v1149_v41, 0.0 }
 0x119   :  { %v1150_v51 = vmul.f32 %v2342_v25, %v1988_v23  ;;  %v1154_v4 = vmul.f32 %v2343_v61, %v1996_v38  ;;  %v1153_v17 = vmul.f32 %v2360_v6, %v1993_v46  ;;  %v2175_v23 = vld [vmem:[#allocation2 + $0xf0] sm:$0xff]   ;;  %v1378_v25 = vadd.f32 %v1377_v29, %v1376_v9 }
 0x11a   :  { %2445 = vset.pattern.permute.xlu2 %v2708_v16  ;;  %v1367_v54 = vadd.f32 %v1366_v8, %v1365_v10  ;;  %v1157_v32 = vmul.f32 %v2361_v62, %v2001_v12  ;;  %v2012_v30 = vunpack.c.l.bf16 %v2175_v23  ;;  %v1355_v37 = vrot.slane %v1354_v60, 4 }
 0x11b   :  { %v1387_v7 = vsel %vm1230_vm0, %v1150_v51, 0.0  ;;  %v1400_v22 = vsel %vm1230_vm0, %v1154_v4, 0.0  ;;  %v1392_v47 = vsel %vm1230_vm0, %v1153_v17, 0.0  ;;  %v2366_v38 = vunpack.i.h.bf16 %v2774_v49 }
 0x11c   :  { %2439 = vset.pattern.permute.xlu1 %v2691_v1  ;;  %v1389_v0 = vadd.f32 %v1388_v57, %v1387_v7  ;;  %v2365_v29 = vunpack.i.l.bf16 %v2774_v49  ;;  %v1380_v61 = vadd.f32 %v1379_v27, %v1378_v25  ;;  %v1405_v41 = vsel %vm1230_vm0, %v1157_v32, 0.0 }
 0x11d   :  { %v2013_v51 = vunpack.c.h.bf16 %v2175_v23  ;;  %v1162_v6 = vmul.f32 %v2366_v38, %v2012_v30 }
 0x11e   :  { %v2376_v46 = vpop.permute.xlu2 %2375  ;;  %v1381_v49 = vrot.slane %v1380_v61, 4 }
 0x11f   :  { %v2378_v12 = vunpack.i.h.bf16 %v2376_v46  ;;  %v2377_v62 = vunpack.i.l.bf16 %v2376_v46 }
 0x122   :  { %2447 = vperm.xlu2 %2445, %v2913_v36  }
 0x124   :  { %2441 = vperm.xlu1 %2439, %v2913_v36  }
 0x126   :  { %v2353_v19 = vpop.permute.xlu1 %2352 }
 0x127   :  { %v2354_v33 = vunpack.i.l.bf16 %v2353_v19  ;;  %v2355_v63 = vunpack.i.h.bf16 %v2353_v19  ;;  %v1401_v19 = vsel %vm1230_vm0, %v1155_v3, 0.0 }
 0x128   :  { %v1402_v56 = vadd.f32 %v1401_v19, %v1400_v22 }
 0x129   :  { %v1152_v40 = vmul.f32 %v2354_v33, %v1992_v28  ;;  %v1156_v42 = vmul.f32 %v2355_v63, %v2000_v44  ;;  %v2004_v28 = vunpack.c.l.bf16 %v2173_v5  ;;  %v1342_v33 = vrot.slane %v1341_v14, 4  ;;  %v2174_v44 = vld [vmem:[#allocation2 + $0xe8] sm:$0xff]   ;;  %v2176_v63 = vld [vmem:[#allocation2 + $0xf8] sm:$0xff]  }
 0x12a   :  { %2457 = vset.pattern.permute.xlu2 %v2703_v13  ;;  %v2008_v57 = vunpack.c.l.bf16 %v2174_v44  ;;  %v2016_v7 = vunpack.c.l.bf16 %v2176_v63 }
 0x12b   :  { %v1390_v15 = vsel %vm1230_vm0, %v1152_v40, 0.0  ;;  %v1403_v48 = vsel %vm1230_vm0, %v1156_v42, 0.0  ;;  %v1343_v59 = vadd.f32 %v1342_v33, %v1341_v14  ;;  %v1356_v40 = vadd.f32 %v1355_v37, %v1354_v60 }
 0x12c   :  { %2451 = vset.pattern.permute.xlu1 %v2695_v2  ;;  %v1391_v26 = vadd.f32 %v1390_v15, %v1389_v0  ;;  %v1404_v20 = vadd.f32 %v1403_v48, %v1402_v56  ;;  %v1158_v35 = vmul.f32 %v2365_v29, %v2004_v28  ;;  %v1382_v15 = vadd.f32 %v1381_v49, %v1380_v61 }
 0x12d   :  { %v1344_v8 = vrot.slane %v1343_v59, 2  ;;  %v1357_v14 = vrot.slane %v1356_v40, 2  ;;  %v1426_v60 = vsel %vm1230_vm0, %v1162_v6, 0.0  ;;  %v1164_v25 = vmul.f32 %v2378_v12, %v2016_v7 }
 0x12e   :  { %v1393_v18 = vadd.f32 %v1392_v47, %v1391_v26  ;;  %v1406_v3 = vadd.f32 %v1405_v41, %v1404_v20  ;;  %v1413_v19 = vsel %vm1230_vm0, %v1158_v35, 0.0  ;;  %v1160_v27 = vmul.f32 %v2377_v62, %v2008_v57 }
 0x12f   :  { %v1358_v48 = vadd.f32 %v1357_v14, %v1356_v40  ;;  %v1383_v26 = vrot.slane %v1382_v15, 2  ;;  %v2009_v56 = vunpack.c.h.bf16 %v2174_v44  ;;  %v2017_v47 = vunpack.c.h.bf16 %v2176_v63 }
 0x130   :  { %v1394_v9 = vrot.slane %v1393_v18, 4  ;;  %v1407_v17 = vrot.slane %v1406_v3, 4  ;;  %v1429_v38 = vsel %vm1230_vm0, %v1164_v25, 0.0  ;;  %v1416_v29 = vsel %vm1230_vm0, %v1160_v27, 0.0 }
 0x131   :  { %v1359_v41 = vrot.slane %v1358_v48, 1 }
 0x132   :  { %2459 = vperm.xlu2 %2457, %v2913_v36   ;;  %v1395_v0 = vadd.f32 %v1394_v9, %v1393_v18  ;;  %v1408_v32 = vadd.f32 %v1407_v17, %v1406_v3  ;;  %v1384_v18 = vadd.f32 %v1383_v26, %v1382_v15  ;;  %v2388_v26 = vpop.permute.xlu2 %2387 }
 0x133   :  { %v1360_v3 = vadd.f32 %v1359_v41, %v1358_v48 }
 0x134   :  { %2453 = vperm.xlu1 %2451, %v2913_v36   ;;  %v1368_v36 = vrot.slane %v1367_v54, 4  ;;  %v1396_v30 = vrot.slane %v1395_v0, 2 }
 0x136   :  { %v2370_v31 = vpop.permute.xlu1 %2369  ;;  %v1369_v4 = vadd.f32 %v1368_v36, %v1367_v54  ;;  %v1345_v54 = vadd.f32 %v1344_v8, %v1343_v59  ;;  %v1397_v44 = vadd.f32 %v1396_v30, %v1395_v0 }
 0x137   :  { %v2372_v52 = vunpack.i.h.bf16 %v2370_v31  ;;  %v2371_v53 = vunpack.i.l.bf16 %v2370_v31 }
 0x138   :  { %v1370_v22 = vrot.slane %v1369_v4, 2  ;;  %v1346_v36 = vrot.slane %v1345_v54, 1  ;;  %v1398_v7 = vrot.slane %v1397_v44, 1 }
 0x139   :  { %v1163_v10 = vmul.f32 %v2372_v52, %v2013_v51  ;;  %v1159_v42 = vmul.f32 %v2371_v53, %v2005_v45  ;;  %v1409_v45 = vrot.slane %v1408_v32, 2 }
 0x13a   :  { %2490 = vset.pattern.permute.xlu2 %v2695_v2  ;;  %v1371_v28 = vadd.f32 %v1370_v22, %v1369_v4  ;;  %v1347_v49 = vadd.f32 %v1346_v36, %v1345_v54  ;;  %v1385_v4 = vrot.slane %v1384_v18, 1 }
 0x13b   :  { %v1427_v5 = vsel %vm1230_vm0, %v1163_v10, 0.0  ;;  %v1414_v23 = vsel %vm1230_vm0, %v1159_v42, 0.0  ;;  %v1410_v9 = vadd.f32 %v1409_v45, %v1408_v32  ;;  %v2177_v32 = vld [vmem:[#allocation2 + $0x100] sm:$0xff]   ;;  %v2390_v45 = vunpack.i.h.bf16 %v2388_v26 }
 0x13c   :  { %2484 = vset.pattern.permute.xlu1 %v2708_v16  ;;  %v1415_v33 = vadd.f32 %v1414_v23, %v1413_v19  ;;  %v1428_v37 = vadd.f32 %v1427_v5, %v1426_v60  ;;  %v1372_v53 = vrot.slane %v1371_v28, 1  ;;  %v1816_v8 = vsel %vm1802_vm1, %v1360_v3, %v1347_v49 }
 0x13d   :  { %v1386_v14 = vadd.f32 %v1385_v4, %v1384_v18  ;;  %v1411_v15 = vrot.slane %v1410_v9, 1  ;;  %v1399_v60 = vadd.f32 %v1398_v7, %v1397_v44  ;;  %v2020_v41 = vunpack.c.l.bf16 %v2177_v32 }
 0x13e   :  { %v1417_v63 = vadd.f32 %v1416_v29, %v1415_v33  ;;  %v1430_v59 = vadd.f32 %v1429_v38, %v1428_v37  ;;  %v1373_v57 = vadd.f32 %v1372_v53, %v1371_v28  ;;  %v2483_v33 = vunpack.i.h.bf16 %v2872_v39 }
 0x13f   :  { %v1412_v25 = vadd.f32 %v1411_v15, %v1410_v9  ;;  %v2021_v37 = vunpack.c.h.bf16 %v2177_v32  ;;  %v2482_v38 = vunpack.i.l.bf16 %v2872_v39  ;;  %v2400_v39 = vpop.permute.xlu2 %2399 }
 0x140   :  { %v1817_v17 = vsel %vm1804_vm2, %v1373_v57, %v1816_v8  ;;  %v2402_v3 = vunpack.i.h.bf16 %v2400_v39  ;;  %v2401_v4 = vunpack.i.l.bf16 %v2400_v39 }
 0x141   :  { %v1818_v23 = vsel %vm1806_vm3, %v1386_v14, %v1817_v17 }
 0x142   :  { %2492 = vperm.xlu2 %2490, %v2724_v24   ;;  %v1819_v27 = vsel %vm1808_vm4, %v1399_v60, %v1818_v23 }
 0x143   :  { %v1820_v30 = vsel %vm1810_vm5, %v1412_v25, %v1819_v27 }
 0x144   :  { %2486 = vperm.xlu1 %2484, %v2724_v24  }
 0x146   :  { %v2382_v31 = vpop.permute.xlu1 %2381 }
 0x147   :  { %v2384_v61 = vunpack.i.h.bf16 %v2382_v31  ;;  %v2383_v20 = vunpack.i.l.bf16 %v2382_v31 }
 0x149   :  { %v1165_v51 = vmul.f32 %v2384_v61, %v2017_v47  ;;  %v1161_v52 = vmul.f32 %v2383_v20, %v2009_v56  ;;  %v2179_v56 = vld [vmem:[#allocation2 + $0x110] sm:$0xff]   ;;  %v2178_v61 = vld [vmem:[#allocation2 + $0x108] sm:$0xff]   ;;  %v2180_v20 = vld [vmem:[#allocation2 + $0x118] sm:$0xff]  }
 0x14a   :  { %2502 = vset.pattern.permute.xlu2 %v2691_v1  ;;  %v2029_v31 = vunpack.c.h.bf16 %v2179_v56  ;;  %v2028_v18 = vunpack.c.l.bf16 %v2179_v56  ;;  %v2032_v53 = vunpack.c.l.bf16 %v2180_v20  ;;  %v2033_v49 = vunpack.c.h.bf16 %v2180_v20  ;;  %v2182_v56 = vld [vmem:[#allocation2 + $0x128] sm:$0xff]  }
 0x14b   :  { %v1431_v40 = vsel %vm1230_vm0, %v1165_v51, 0.0  ;;  %v1418_v46 = vsel %vm1230_vm0, %v1161_v52, 0.0  ;;  %v2389_v51 = vunpack.i.l.bf16 %v2388_v26  ;;  %v2024_v52 = vunpack.c.l.bf16 %v2178_v61 }
 0x14c   :  { %v1419_v6 = vadd.f32 %v1418_v46, %v1417_v63  ;;  %v1432_v35 = vadd.f32 %v1431_v40, %v1430_v59  ;;  %2496 = vset.pattern.permute.xlu1 %v2703_v13  ;;  %v1171_v59 = vmul.f32 %v2483_v33, %v2029_v31  ;;  %v1167_v40 = vmul.f32 %v2482_v38, %v2021_v37 }
 0x14d   :  { %v1170_v46 = vmul.f32 %v2390_v45, %v2028_v18  ;;  %v2523_v37 = vunpack.i.h.bf16 %v2884_v50  ;;  %v2522_v31 = vunpack.i.l.bf16 %v2884_v50 }
 0x14e   :  { %v1420_v10 = vrot.slane %v1419_v6, 4  ;;  %v1433_v42 = vrot.slane %v1432_v35, 4  ;;  %v1453_v7 = vsel %vm1230_vm0, %v1171_v59, 0.0 }
 0x150   :  { %v1421_v12 = vadd.f32 %v1420_v10, %v1419_v6  ;;  %v1434_v62 = vadd.f32 %v1433_v42, %v1432_v35  ;;  %v1166_v6 = vmul.f32 %v2389_v51, %v2020_v41  ;;  %v2025_v35 = vunpack.c.h.bf16 %v2178_v61 }
 0x151   :  { %v1440_v10 = vsel %vm1230_vm0, %v1167_v40, 0.0  ;;  %v1452_v42 = vsel %vm1230_vm0, %v1170_v46, 0.0  ;;  %v2040_v61 = vunpack.c.l.bf16 %v2182_v56  ;;  %v1052_v51 = vperm.slane %v2719_v21, 6 }
 0x152   :  { %v1422_v19 = vrot.slane %v1421_v12, 2  ;;  %v1435_v22 = vrot.slane %v1434_v62, 2  ;;  %2504 = vperm.xlu2 %2502, %v2743_v34   ;;  %v1169_v8 = vmul.f32 %v2401_v4, %v2025_v35  ;;  %v1454_v60 = vadd.f32 %v1453_v7, %v1452_v42 }
 0x153   :  { %v1176_v39 = vmul.f32 %v2522_v31, %v2040_v61  ;;  %v2041_v4 = vunpack.c.h.bf16 %v2182_v56 }
 0x154   :  { %v1423_v0 = vadd.f32 %v1422_v19, %v1421_v12  ;;  %v1436_v5 = vadd.f32 %v1435_v22, %v1434_v62  ;;  %2498 = vperm.xlu1 %2496, %v2724_v24   ;;  %v1439_v12 = vsel %vm1230_vm0, %v1166_v6, 0.0  ;;  %v1173_v62 = vmul.f32 %v2402_v3, %v2033_v49  ;;  %v2181_v19 = vld [vmem:[#allocation2 + $0x120] sm:$0xff]   ;;  %v2183_v22 = vld [vmem:[#allocation2 + $0x130] sm:$0xff]  }
 0x155   :  { %v1441_v17 = vadd.f32 %v1440_v10, %v1439_v12  ;;  %v2045_v26 = vunpack.c.h.bf16 %v2183_v22  ;;  %v1468_v12 = vsel %vm1230_vm0, %v1176_v39, 0.0 }
 0x156   :  { %v1424_v54 = vrot.slane %v1423_v0, 1  ;;  %v1437_v48 = vrot.slane %v1436_v5, 1  ;;  %v2394_v36 = vpop.permute.xlu1 %2393  ;;  %v1457_v27 = vsel %vm1230_vm0, %v1173_v62, 0.0 }
 0x157   :  { %v2396_v44 = vunpack.i.h.bf16 %v2394_v36  ;;  %v2395_v63 = vunpack.i.l.bf16 %v2394_v36 }
 0x158   :  { %v1425_v47 = vadd.f32 %v1424_v54, %v1423_v0  ;;  %v1438_v28 = vadd.f32 %v1437_v48, %v1436_v5  ;;  %v2412_v0 = vpop.permute.xlu2 %2411  ;;  %v1444_v54 = vsel %vm1230_vm0, %v1169_v8, 0.0  ;;  %v2037_v48 = vunpack.c.h.bf16 %v2181_v19 }
 0x159   :  { %v1172_v9 = vmul.f32 %v2396_v44, %v2032_v53  ;;  %v1168_v57 = vmul.f32 %v2395_v63, %v2024_v52  ;;  %v2414_v32 = vunpack.i.h.bf16 %v2412_v0  ;;  %v1077_v52 = vperm.slane %v2719_v21, 7  ;;  %v1889_v53 = vld [vmem:[%s3158_s2 + $0x8] sm:$0xff]  ;;  %v1888_v21 = vld [vmem:[%s3158_s2] sm:$0xff] }
 0x15a   :  { %v1821_v24 = vsel %vm1812_vm6, %v1425_v47, %v1820_v30  ;;  %2530 = vset.pattern.permute.xlu2 %v2703_v13  ;;  %v2184_v47 = vld [vmem:[#allocation2 + $0x138] sm:$0xff]   ;;  %v2044_v30 = vunpack.c.l.bf16 %v2183_v22  ;;  %1686 = vmatpush.bf16.msra.mxu0 %v1889_v53 }
 0x15b   :  { %v1822_v29 = vsel %vm1814_vm7, %v1438_v28, %v1821_v24  ;;  %v1455_v14 = vsel %vm1230_vm0, %v1172_v9, 0.0  ;;  %v1442_v15 = vsel %vm1230_vm0, %v1168_v57, 0.0  ;;  %v2036_v28 = vunpack.c.l.bf16 %v2181_v19  ;;  %2209 = vmatpush.bf16.msra.mxu1 %v1889_v53  ;;  %v2187_v53 = vld [vmem:[#allocation2 + $0x150] sm:$0xff]  }
 0x15c   :  { %1842 = vst.msk [vmem:[#allocation5 + $0x10] sm:$0xff] %vm1230_vm0, %v1822_v29  ;;  %2524 = vset.pattern.permute.xlu1 %v2695_v2  ;;  %v1443_v23 = vadd.f32 %v1442_v15, %v1441_v17  ;;  %v1456_v25 = vadd.f32 %v1455_v14, %v1454_v60  ;;  %v2048_v20 = vunpack.c.l.bf16 %v2184_v47  ;;  %v1179_v36 = vmul.f32 %v2414_v32, %v2045_v26  ;;  %v1886_v14 = vld [vmem:[%s3156_s0] sm:$0xff] }
 0x15d   :  { %v3003_v59 = vpack.i.bf16 %v1077_v52, %v1052_v51  ;;  %v2049_v9 = vunpack.c.h.bf16 %v2184_v47 }
 0x15e   :  { %v1445_v38 = vadd.f32 %v1444_v54, %v1443_v23  ;;  %v1458_v29 = vadd.f32 %v1457_v27, %v1456_v25  ;;  %v1180_v63 = vmul.f32 %v2523_v37, %v2048_v20  ;;  %v1479_v40 = vsel %vm1230_vm0, %v1179_v36, 0.0  ;;  %1687 = vmatpush.bf16.msra.mxu0 %v1888_v21 }
 0x15f   :  { %2589 = vperm.xlu0 %2553, %v3003_v59   ;;  %2210 = vmatpush.bf16.msra.mxu1 %v1888_v21  ;;  %v2653_v54 = vmov 1  }
 0x160   :  { %v1446_v44 = vrot.slane %v1445_v38, 4  ;;  %v1459_v50 = vrot.slane %v1458_v29, 4  ;;  %v1481_v42 = vsel %vm1230_vm0, %v1180_v63, 0.0  ;;  %v2424_v31 = vpop.permute.xlu2 %2423 }
 0x161   :  { %1884 = vmatmul.msk.bf16.vlgmr.msra.gmra.mxu0 %vm1673_vm8, %v1886_v14 }
 0x162   :  { %2532 = vperm.xlu2 %2530, %v2743_v34   ;;  %v1447_v49 = vadd.f32 %v1446_v44, %v1445_v38  ;;  %v1460_v3 = vadd.f32 %v1459_v50, %v1458_v29 }
 0x164   :  { %2526 = vperm.xlu1 %2524, %v2743_v34   ;;  %v2413_v34 = vunpack.i.l.bf16 %v2412_v0  ;;  %v1448_v15 = vrot.slane %v1447_v49, 2  ;;  %v1461_v17 = vrot.slane %v1460_v3, 2 }
 0x166   :  { %v2406_v5 = vpop.permute.xlu1 %2405  ;;  %v1175_v41 = vmul.f32 %v2413_v34, %v2037_v48  ;;  %v3028_v48 = vld [vmem:[%s3159_s3] sm:$0xff]  ;;  %v1449_v26 = vadd.f32 %v1448_v15, %v1447_v49  ;;  %v1462_v32 = vadd.f32 %v1461_v17, %v1460_v3  ;;  %v2060_v49 = vunpack.c.l.bf16 %v2187_v53 }
 0x167   :  { %v2408_v33 = vunpack.i.h.bf16 %v2406_v5  ;;  %v2407_v24 = vunpack.i.l.bf16 %v2406_v5  ;;  %2595 = vset.pattern.permute.xlu0 %v2653_v54  ;;  %v2426_v3 = vunpack.i.h.bf16 %v2424_v31 }
 0x168   :  { %v1466_v46 = vsel %vm1230_vm0, %v1175_v41, 0.0  ;;  %1730 = vperm.xlu0 %2595, %v3028_v48  }
 0x169   :  { %v1178_v18 = vmul.f32 %v2408_v33, %v2044_v30  ;;  %v1174_v45 = vmul.f32 %v2407_v24, %v2036_v28  ;;  %v1450_v30 = vrot.slane %v1449_v26, 1  ;;  %v1463_v33 = vrot.slane %v1462_v32, 1 }
 0x16a   :  { %2542 = vset.pattern.permute.xlu2 %v2708_v16  ;;  %v1186_v14 = vmul.f32 %v2426_v3, %v2060_v49 }
 0x16b   :  { %v1478_v6 = vsel %vm1230_vm0, %v1178_v18, 0.0  ;;  %v1465_v35 = vsel %vm1230_vm0, %v1174_v45, 0.0  ;;  %v1464_v61 = vadd.f32 %v1463_v33, %v1462_v32  ;;  %v2185_v18 = vld [vmem:[#allocation2 + $0x140] sm:$0xff]  }
 0x16c   :  { %2536 = vset.pattern.permute.xlu1 %v2691_v1  ;;  %v1480_v57 = vadd.f32 %v1479_v40, %v1478_v6  ;;  %v1467_v7 = vadd.f32 %v1466_v46, %v1465_v35  ;;  %v2053_v44 = vunpack.c.h.bf16 %v2185_v18  ;;  %v2052_v39 = vunpack.c.l.bf16 %v2185_v18  ;;  %v2436_v46 = vpop.permute.xlu2 %2435  ;;  %v2189_v33 = vld [vmem:[#allocation2 + $0x160] sm:$0xff]  }
 0x16d   :  { %v2425_v40 = vunpack.i.l.bf16 %v2424_v31  ;;  %v2061_v35 = vunpack.c.h.bf16 %v2187_v53  ;;  %v3058_v31 = vld [vmem:[%s3159_s3 + $0x8] sm:$0xff]  ;;  %v2068_v18 = vunpack.c.l.bf16 %v2189_v33 }
 0x16e   :  { %v1469_v22 = vadd.f32 %v1468_v12, %v1467_v7  ;;  %v1482_v0 = vadd.f32 %v1481_v42, %v1480_v57  ;;  %v2437_v7 = vunpack.i.l.bf16 %v2436_v46  ;;  %v2561_v42 = vpop.permute.xlu0 %2560 }
 0x172   :  { %2544 = vperm.xlu2 %2542, %v2760_v43  }
 0x174   :  { %2538 = vperm.xlu1 %2536, %v2760_v43  }
 0x176   :  { %v2418_v10 = vpop.permute.xlu1 %2417 }
 0x177   :  { %v2420_v62 = vunpack.i.h.bf16 %v2418_v10  ;;  %v2419_v8 = vunpack.i.l.bf16 %v2418_v10  ;;  %v1182_v10 = vmul.f32 %v2425_v40, %v2052_v39  ;;  %v2192_v40 = vld [vmem:[#allocation2 + $0x178] sm:$0xff]  }
 0x179   :  { %v1181_v60 = vmul.f32 %v2420_v62, %v2049_v9  ;;  %v1177_v19 = vmul.f32 %v2419_v8, %v2041_v4  ;;  %v2188_v4 = vld [vmem:[#allocation2 + $0x158] sm:$0xff]   ;;  %v2438_v8 = vunpack.i.h.bf16 %v2436_v46 }
 0x17a   :  { %2570 = vset.pattern.permute.xlu2 %v2691_v1  ;;  %v1451_v1 = vadd.f32 %v1450_v30, %v1449_v26  ;;  %v2064_v62 = vunpack.c.l.bf16 %v2188_v4 }
 0x17b   :  { %v1483_v5 = vsel %vm1230_vm0, %v1181_v60, 0.0  ;;  %v1470_v23 = vsel %vm1230_vm0, %v1177_v19, 0.0  ;;  %v2562_v19 = vunpack.i.l.bf16 %v2561_v42 }
 0x17c   :  { %v1471_v25 = vadd.f32 %v1470_v23, %v1469_v22  ;;  %v1484_v27 = vadd.f32 %v1483_v5, %v1482_v0  ;;  %2564 = vset.pattern.permute.xlu1 %v2703_v13  ;;  %v1887_v13 = vld [vmem:[%s3156_s0 + $0x8] sm:$0xff]  ;;  %v1823_v52 = vsel %vm1802_vm1, %v1464_v61, %v1451_v1  ;;  %v1491_v22 = vsel %vm1230_vm0, %v1182_v10, 0.0 }
 0x17d   :  { %1885 = vmatmul.msk.bf16.vlgmr.msra.gmra.mxu1 %vm1673_vm8, %v1887_v13  ;;  %v1188_v0 = vmul.f32 %v2438_v8, %v2064_v62  ;;  %v2065_v5 = vunpack.c.h.bf16 %v2188_v4  ;;  %v2563_v23 = vunpack.i.h.bf16 %v2561_v42  ;;  %v2448_v13 = vpop.permute.xlu2 %2447  ;;  %v2069_v1 = vunpack.c.h.bf16 %v2189_v33 }
 0x17e   :  { %v1472_v34 = vrot.slane %v1471_v25, 4  ;;  %v1485_v56 = vrot.slane %v1484_v27, 4  ;;  %v2080_v42 = vunpack.c.l.bf16 %v2192_v40 }
 0x180   :  { %v1473_v47 = vadd.f32 %v1472_v34, %v1471_v25  ;;  %v1486_v28 = vadd.f32 %v1485_v56, %v1484_v27  ;;  %v1507_v34 = vsel %vm1230_vm0, %v1188_v0, 0.0  ;;  %v1189_v56 = vmul.f32 %v2563_v23, %v2065_v5 }
 0x182   :  { %v1474_v24 = vrot.slane %v1473_v47, 2  ;;  %v1487_v37 = vrot.slane %v1486_v28, 2  ;;  %2572 = vperm.xlu2 %2570, %v3003_v59  }
 0x184   :  { %v1475_v38 = vadd.f32 %v1474_v24, %v1473_v47  ;;  %v1488_v29 = vadd.f32 %v1487_v37, %v1486_v28  ;;  %2566 = vperm.xlu1 %2564, %v2760_v43   ;;  %v2186_v43 = vld [vmem:[#allocation2 + $0x148] sm:$0xff]   ;;  %v2191_v24 = vld [vmem:[#allocation2 + $0x170] sm:$0xff]   ;;  %v1509_v37 = vsel %vm1230_vm0, %v1189_v56, 0.0 }
 0x185   :  { %v2056_v57 = vunpack.c.l.bf16 %v2186_v43  ;;  %v2057_v15 = vunpack.c.h.bf16 %v2186_v43  ;;  %v2077_v61 = vunpack.c.h.bf16 %v2191_v24 }
 0x186   :  { %v1476_v20 = vrot.slane %v1475_v38, 1  ;;  %v1489_v36 = vrot.slane %v1488_v29, 1  ;;  %v2430_v41 = vpop.permute.xlu1 %2429 }
 0x187   :  { %v2431_v50 = vunpack.i.l.bf16 %v2430_v41  ;;  %v2432_v21 = vunpack.i.h.bf16 %v2430_v41  ;;  %v1184_v60 = vmul.f32 %v2437_v7, %v2056_v57  ;;  %v1185_v26 = vmul.f32 %v2562_v19, %v2057_v15 }
 0x188   :  { %v1477_v45 = vadd.f32 %v1476_v20, %v1475_v38  ;;  %v1490_v51 = vadd.f32 %v1489_v36, %v1488_v29  ;;  %v2654_v29 = vmov 0   ;;  %v2450_v20 = vunpack.i.h.bf16 %v2448_v13 }
 0x189   :  { %v1183_v9 = vmul.f32 %v2431_v50, %v2053_v44  ;;  %v1187_v12 = vmul.f32 %v2432_v21, %v2061_v35  ;;  %v1494_v27 = vsel %vm1230_vm0, %v1184_v60, 0.0  ;;  %v1496_v28 = vsel %vm1230_vm0, %v1185_v26, 0.0  ;;  %v2190_v50 = vld [vmem:[#allocation2 + $0x168] sm:$0xff]  }
 0x18a   :  { %v1824_v63 = vsel %vm1804_vm2, %v1477_v45, %v1823_v52  ;;  %2582 = vset.pattern.permute.xlu2 %v2695_v2  ;;  %v1504_v2 = vsel %vm1230_vm0, %v1186_v14, 0.0  ;;  %v2449_v36 = vunpack.i.l.bf16 %v2448_v13  ;;  %v2076_v45 = vunpack.c.l.bf16 %v2191_v24 }
 0x18b   :  { %v3041_v6 = vsel %vm1806_vm3, %v1490_v51, %v1824_v63  ;;  %v1492_v17 = vsel %vm1230_vm0, %v1183_v9, 0.0  ;;  %v1195_v63 = vmul.f32 %v2450_v20, %v2077_v61  ;;  %v2073_v43 = vunpack.c.h.bf16 %v2190_v50  ;;  %v1702_v9 = vld [vmem:[%s3159_s3 + $0x18] sm:$0xff] }
 0x18c   :  { %2576 = vset.pattern.permute.xlu1 %v2708_v16  ;;  %v1505_v16 = vsel %vm1230_vm0, %v1187_v12, 0.0  ;;  %v1493_v25 = vadd.f32 %v1492_v17, %v1491_v22  ;;  %v2460_v53 = vpop.permute.xlu2 %2459  ;;  %v1191_v39 = vmul.f32 %v2449_v36, %v2069_v1  ;;  %v2081_v35 = vunpack.c.h.bf16 %v2192_v40  ;;  %v2195_v40 = vld [vmem:[#allocation2 + $0x190] sm:$0xff]  }
 0x18d   :  { %v1506_v32 = vadd.f32 %v1505_v16, %v1504_v2  ;;  %v2462_v21 = vunpack.i.h.bf16 %v2460_v53  ;;  %v2461_v49 = vunpack.i.l.bf16 %v2460_v53  ;;  %v1531_v7 = vsel %vm1230_vm0, %v1195_v63, 0.0 }
 0x18e   :  { %v1495_v47 = vadd.f32 %v1494_v27, %v1493_v25  ;;  %v2072_v10 = vunpack.c.l.bf16 %v2190_v50  ;;  %v1518_v62 = vsel %vm1230_vm0, %v1191_v39, 0.0  ;;  %v2193_v39 = vld [vmem:[#allocation2 + $0x180] sm:$0xff]  }
 0x18f   :  { %v1508_v30 = vadd.f32 %v1507_v34, %v1506_v32  ;;  %v1197_v14 = vmul.f32 %v2462_v21, %v2081_v35  ;;  %v1193_v15 = vmul.f32 %v2461_v49, %v2073_v43  ;;  %v2196_v49 = vld [vmem:[#allocation2 + $0x198] sm:$0xff]  }
 0x190   :  { %v1497_v38 = vadd.f32 %v1496_v28, %v1495_v47 }
 0x191   :  { %v1510_v41 = vadd.f32 %v1509_v37, %v1508_v30  ;;  %v1535_v2 = vsel %vm1230_vm0, %v1197_v14, 0.0  ;;  %v1522_v34 = vsel %vm1230_vm0, %v1193_v15, 0.0 }
 0x192   :  { %2584 = vperm.xlu2 %2582, %v3003_v59   ;;  %v1498_v44 = vrot.slane %v1497_v38, 4 }
 0x193   :  { %v1511_v46 = vrot.slane %v1510_v41, 4 }
 0x194   :  { %2578 = vperm.xlu1 %2576, %v3003_v59   ;;  %v1499_v57 = vadd.f32 %v1498_v44, %v1497_v38 }
 0x195   :  { %v1512_v12 = vadd.f32 %v1511_v46, %v1510_v41  ;;  %v2085_v46 = vunpack.c.h.bf16 %v2193_v39 }
 0x196   :  { %v2442_v59 = vpop.permute.xlu1 %2441  ;;  %v1500_v16 = vrot.slane %v1499_v57, 2 }
 0x197   :  { %v2444_v51 = vunpack.i.h.bf16 %v2442_v59  ;;  %v2443_v52 = vunpack.i.l.bf16 %v2442_v59  ;;  %v1513_v27 = vrot.slane %v1512_v12, 2 }
 0x198   :  { %v1501_v56 = vadd.f32 %v1500_v16, %v1499_v57  ;;  %v2467_v57 = vunpack.i.h.bf16 %v2782_v55 }
 0x199   :  { %v1194_v3 = vmul.f32 %v2444_v51, %v2076_v45  ;;  %v1190_v4 = vmul.f32 %v2443_v52, %v2068_v18  ;;  %v1514_v33 = vadd.f32 %v1513_v27, %v1512_v12 }
 0x19a   :  { %2594 = vset.pattern.permute.xlu2 %v2654_v29  ;;  %v1502_v24 = vrot.slane %v1501_v56, 1 }
 0x19b   :  { %1711 = vperm.xlu2 %2594, %v3058_v31   ;;  %v1530_v17 = vsel %vm1230_vm0, %v1194_v3, 0.0  ;;  %v1517_v60 = vsel %vm1230_vm0, %v1190_v4, 0.0  ;;  %v1515_v1 = vrot.slane %v1514_v33, 1  ;;  %v2084_v4 = vunpack.c.l.bf16 %v2193_v39  ;;  %v2200_v39 = vld [vmem:[#allocation2 + $0x1b8] sm:$0xff]  }
 0x19c   :  { %2593 = vset.pattern.permute.xlu1 %v2654_v29  ;;  %v1532_v23 = vadd.f32 %v1531_v7, %v1530_v17  ;;  %v1519_v25 = vadd.f32 %v1518_v62, %v1517_v60  ;;  %v1503_v61 = vadd.f32 %v1502_v24, %v1501_v56  ;;  %v2493_v3 = vpop.permute.xlu2 %2492  ;;  %v2466_v7 = vunpack.i.l.bf16 %v2782_v55 }
 0x19d   :  { %1706 = vperm.xlu1 %2593, %v3028_v48   ;;  %v1701_v48 = vld [vmem:[%s3159_s3 + $0x10] sm:$0xff]  ;;  %v1516_v45 = vadd.f32 %v1515_v1, %v1514_v33  ;;  %v2494_v14 = vunpack.i.l.bf16 %v2493_v3 }
 0x19e   :  { %v1198_v17 = vmul.f32 %v2466_v7, %v2084_v4 }
 0x1a3   :  { %1721 = vperm.xlu2 %2594, %v1702_v9  }
 0x1a5   :  { %1716 = vperm.xlu1 %2593, %v1701_v48  }
 0x1a6   :  { %v2454_v8 = vpop.permute.xlu1 %2453 }
 0x1a7   :  { %v2456_v19 = vunpack.i.h.bf16 %v2454_v8  ;;  %v2455_v22 = vunpack.i.l.bf16 %v2454_v8  ;;  %v2495_v8 = vunpack.i.h.bf16 %v2493_v3  ;;  %v2112_v3 = vunpack.c.l.bf16 %v2200_v39 }
 0x1a9   :  { %v1196_v0 = vmul.f32 %v2456_v19, %v2080_v42  ;;  %v1192_v5 = vmul.f32 %v2455_v22, %v2072_v10  ;;  %v2096_v42 = vunpack.c.l.bf16 %v2196_v49  ;;  %v2097_v19 = vunpack.c.h.bf16 %v2196_v49 }
 0x1ab   :  { %v1533_v26 = vsel %vm1230_vm0, %v1196_v0, 0.0  ;;  %v1520_v32 = vsel %vm1230_vm0, %v1192_v5, 0.0  ;;  %2597 = vset.pattern.permute.xlu2 %v2653_v54  ;;  %v1204_v0 = vmul.f32 %v2495_v8, %v2096_v42 }
 0x1ac   :  { %v1521_v13 = vadd.f32 %v1520_v32, %v1519_v25  ;;  %v1534_v47 = vadd.f32 %v1533_v26, %v1532_v23  ;;  %1738 = vperm.xlu2 %2597, %v1701_v48   ;;  %v2093_v48 = vunpack.c.h.bf16 %v2195_v40  ;;  %v2505_v25 = vpop.permute.xlu2 %2504  ;;  %v1543_v26 = vsel %vm1230_vm0, %v1198_v17, 0.0  ;;  %v2197_v32 = vld [vmem:[#allocation2 + $0x1a0] sm:$0xff]  }
 0x1ad   :  { %2596 = vset.pattern.permute.xlu1 %v2653_v54  ;;  %v2101_v24 = vunpack.c.h.bf16 %v2197_v32 }
 0x1ae   :  { %v1523_v28 = vadd.f32 %v1522_v34, %v1521_v13  ;;  %v1536_v30 = vadd.f32 %v1535_v2, %v1534_v47  ;;  %1734 = vperm.xlu1 %2596, %v3058_v31   ;;  %v1826_v31 = vsel %vm1808_vm4, %v1503_v61, %v3041_v6  ;;  %v2194_v6 = vld [vmem:[#allocation2 + $0x188] sm:$0xff]   ;;  %v2199_v34 = vld [vmem:[#allocation2 + $0x1b0] sm:$0xff]  }
 0x1af   :  { %v1827_v44 = vsel %vm1810_vm5, %v1516_v45, %v1826_v31  ;;  %v2088_v10 = vunpack.c.l.bf16 %v2194_v6  ;;  %v2089_v60 = vunpack.c.h.bf16 %v2194_v6  ;;  %v2108_v1 = vunpack.c.l.bf16 %v2199_v34 }
 0x1b0   :  { %v1524_v37 = vrot.slane %v1523_v28, 4  ;;  %v1537_v38 = vrot.slane %v1536_v30, 4  ;;  %v2506_v45 = vunpack.i.l.bf16 %v2505_v25 }
 0x1b1   :  { %v1200_v5 = vmul.f32 %v2494_v14, %v2088_v10 }
 0x1b2   :  { %v1525_v59 = vadd.f32 %v1524_v37, %v1523_v28  ;;  %v1538_v29 = vadd.f32 %v1537_v38, %v1536_v30  ;;  %v1559_v30 = vsel %vm1230_vm0, %v1204_v0, 0.0  ;;  %v2109_v37 = vunpack.c.h.bf16 %v2199_v34 }
 0x1b3   :  { %v1546_v33 = vsel %vm1230_vm0, %v1200_v5, 0.0  ;;  %v2512_v38 = vunpack.i.h.bf16 %v2877_v58 }
 0x1b4   :  { %v1526_v20 = vrot.slane %v1525_v59, 2  ;;  %v1539_v36 = vrot.slane %v1538_v29, 2 }
 0x1b6   :  { %v1527_v41 = vadd.f32 %v1526_v20, %v1525_v59  ;;  %v1540_v18 = vadd.f32 %v1539_v36, %v1538_v29  ;;  %1742 = vperm.xlu1 %2596, %v1702_v9   ;;  %v2487_v50 = vpop.permute.xlu1 %2486  ;;  %v2092_v9 = vunpack.c.l.bf16 %v2195_v40  ;;  %v2511_v59 = vunpack.i.l.bf16 %v2877_v58 }
 0x1b7   :  { %v2489_v35 = vunpack.i.h.bf16 %v2487_v50  ;;  %v2488_v21 = vunpack.i.l.bf16 %v2487_v50  ;;  %v2100_v29 = vunpack.c.l.bf16 %v2197_v32  ;;  %v2113_v40 = vunpack.c.h.bf16 %v2200_v39  ;;  %v2204_v39 = vld [vmem:[#allocation2 + $0x1d8] sm:$0xff]  }
 0x1b8   :  { %v1528_v51 = vrot.slane %v1527_v41, 1  ;;  %v1541_v54 = vrot.slane %v1540_v18, 1  ;;  %v1202_v15 = vmul.f32 %v2467_v57, %v2092_v9 }
 0x1b9   :  { %v1203_v12 = vmul.f32 %v2489_v35, %v2093_v48  ;;  %v1199_v62 = vmul.f32 %v2488_v21, %v2085_v46  ;;  %v1206_v50 = vmul.f32 %v2506_v45, %v2100_v29  ;;  %v2201_v29 = vld [vmem:[#allocation2 + $0x1c0] sm:$0xff]  }
 0x1ba   :  { %v1529_v52 = vadd.f32 %v1528_v51, %v1527_v41  ;;  %v1542_v53 = vadd.f32 %v1541_v54, %v1540_v18  ;;  %v1556_v27 = vsel %vm1230_vm0, %v1202_v15, 0.0  ;;  %v2507_v18 = vunpack.i.h.bf16 %v2505_v25 }
 0x1bb   :  { %v1557_v22 = vsel %vm1230_vm0, %v1203_v12, 0.0  ;;  %v1544_v16 = vsel %vm1230_vm0, %v1199_v62, 0.0  ;;  %v1569_v9 = vsel %vm1230_vm0, %v1206_v50, 0.0  ;;  %v2117_v45 = vunpack.c.h.bf16 %v2201_v29 }
 0x1bc   :  { %v1828_v63 = vsel %vm1812_vm6, %v1529_v52, %v1827_v44  ;;  %v1545_v56 = vadd.f32 %v1544_v16, %v1543_v26  ;;  %v1558_v13 = vadd.f32 %v1557_v22, %v1556_v27  ;;  %v2533_v54 = vpop.permute.xlu2 %2532  ;;  %v1211_v52 = vmul.f32 %v2512_v38, %v2109_v37 }
 0x1bd   :  { %v1829_v43 = vsel %vm1814_vm7, %v1542_v53, %v1828_v63  ;;  %v1207_v53 = vmul.f32 %v2511_v59, %v2101_v24  ;;  %v1210_v44 = vmul.f32 %v2507_v18, %v2108_v1  ;;  %v2198_v63 = vld [vmem:[#allocation2 + $0x1a8] sm:$0xff]   ;;  %v2534_v46 = vunpack.i.l.bf16 %v2533_v54  ;;  %v2203_v1 = vld [vmem:[#allocation2 + $0x1d0] sm:$0xff]  }
 0x1be   :  { %1843 = vst.msk [vmem:[#allocation5 + $0x20] sm:$0xff] %vm1230_vm0, %v1829_v43  ;;  %v1547_v36 = vadd.f32 %v1546_v33, %v1545_v56  ;;  %v1560_v41 = vadd.f32 %v1559_v30, %v1558_v13  ;;  %v2105_v58 = vunpack.c.h.bf16 %v2198_v63  ;;  %v2535_v43 = vunpack.i.h.bf16 %v2533_v54 }
 0x1bf   :  { %v1583_v21 = vsel %vm1230_vm0, %v1211_v52, 0.0  ;;  %v1570_v6 = vsel %vm1230_vm0, %v1207_v53, 0.0  ;;  %v2104_v49 = vunpack.c.l.bf16 %v2198_v63  ;;  %v1582_v4 = vsel %vm1230_vm0, %v1210_v44, 0.0  ;;  %v2202_v63 = vld [vmem:[#allocation2 + $0x1c8] sm:$0xff]  }
 0x1c0   :  { %v1213_v7 = vmul.f32 %v2535_v43, %v2113_v40  ;;  %v1209_v10 = vmul.f32 %v2534_v46, %v2105_v58  ;;  %v1571_v17 = vadd.f32 %v1570_v6, %v1569_v9  ;;  %v2124_v50 = vunpack.c.l.bf16 %v2203_v1 }
 0x1c1   :  { %v2128_v6 = vunpack.c.l.bf16 %v2204_v39 }
 0x1c2   :  { %v1574_v22 = vsel %vm1230_vm0, %v1209_v10, 0.0 }
 0x1c6   :  { %v2499_v23 = vpop.permute.xlu1 %2498 }
 0x1c7   :  { %v2501_v2 = vunpack.i.h.bf16 %v2499_v23  ;;  %v2500_v55 = vunpack.i.l.bf16 %v2499_v23 }
 0x1c9   :  { %v1205_v47 = vmul.f32 %v2501_v2, %v2097_v19  ;;  %v1201_v28 = vmul.f32 %v2500_v55, %v2089_v60  ;;  %v1584_v60 = vadd.f32 %v1583_v21, %v1582_v4  ;;  %v1587_v19 = vsel %vm1230_vm0, %v1213_v7, 0.0 }
 0x1ca   :  { %v2120_v21 = vunpack.c.l.bf16 %v2202_v63 }
 0x1cb   :  { %v1561_v61 = vsel %vm1230_vm0, %v1205_v47, 0.0  ;;  %v1548_v20 = vsel %vm1230_vm0, %v1201_v28, 0.0 }
 0x1cc   :  { %v1549_v31 = vadd.f32 %v1548_v20, %v1547_v36  ;;  %v1562_v51 = vadd.f32 %v1561_v61, %v1560_v41  ;;  %v2545_v13 = vpop.permute.xlu2 %2544 }
 0x1cd   :  { %v2547_v44 = vunpack.i.h.bf16 %v2545_v13  ;;  %v2546_v40 = vunpack.i.l.bf16 %v2545_v13  ;;  %v2207_v13 = vld [vmem:[#allocation2 + $0x1f0] sm:$0xff]  }
 0x1ce   :  { %v1550_v48 = vrot.slane %v1549_v31, 4  ;;  %v1563_v35 = vrot.slane %v1562_v51, 4 }
 0x1cf   :  { %v1215_v9 = vmul.f32 %v2546_v40, %v2117_v45 }
 0x1d0   :  { %v1551_v42 = vadd.f32 %v1550_v48, %v1549_v31  ;;  %v1564_v12 = vadd.f32 %v1563_v35, %v1562_v51  ;;  %v2125_v31 = vunpack.c.h.bf16 %v2203_v1  ;;  %v2116_v51 = vunpack.c.l.bf16 %v2201_v29 }
 0x1d2   :  { %v1552_v16 = vrot.slane %v1551_v42, 2  ;;  %v1565_v0 = vrot.slane %v1564_v12, 2  ;;  %v1219_v4 = vmul.f32 %v2547_v44, %v2125_v31 }
 0x1d4   :  { %v1553_v26 = vadd.f32 %v1552_v16, %v1551_v42  ;;  %v1566_v32 = vadd.f32 %v1565_v0, %v1564_v12  ;;  %v1609_v12 = vsel %vm1230_vm0, %v1219_v4, 0.0 }
 0x1d6   :  { %v2527_v57 = vpop.permute.xlu1 %2526  ;;  %v1554_v30 = vrot.slane %v1553_v26, 1  ;;  %v1567_v33 = vrot.slane %v1566_v32, 1 }
 0x1d7   :  { %v2529_v62 = vunpack.i.h.bf16 %v2527_v57  ;;  %v2528_v8 = vunpack.i.l.bf16 %v2527_v57 }
 0x1d8   :  { %v1555_v61 = vadd.f32 %v1554_v30, %v1553_v26  ;;  %v1568_v20 = vadd.f32 %v1567_v33, %v1566_v32  ;;  %v2205_v33 = vld [vmem:[#allocation2 + $0x1e0] sm:$0xff]  }
 0x1d9   :  { %v1212_v14 = vmul.f32 %v2529_v62, %v2112_v3  ;;  %v1208_v15 = vmul.f32 %v2528_v8, %v2104_v49  ;;  %v2552_v49 = vunpack.i.h.bf16 %v2896_v11  ;;  %v2551_v3 = vunpack.i.l.bf16 %v2896_v11 }
 0x1da   :  { %v1830_v58 = vsel %vm1802_vm1, %v1568_v20, %v1555_v61  ;;  %v1596_v62 = vsel %vm1230_vm0, %v1215_v9, 0.0  ;;  %v2206_v61 = vld [vmem:[#allocation2 + $0x1e8] sm:$0xff]   ;;  %v2132_v20 = vunpack.c.l.bf16 %v2205_v33 }
 0x1db   :  { %v1585_v5 = vsel %vm1230_vm0, %v1212_v14, 0.0  ;;  %v1572_v23 = vsel %vm1230_vm0, %v1208_v15, 0.0  ;;  %v1220_v10 = vmul.f32 %v2552_v49, %v2128_v6  ;;  %v1216_v42 = vmul.f32 %v2551_v3, %v2120_v21 }
 0x1dc   :  { %v1573_v25 = vadd.f32 %v1572_v23, %v1571_v17  ;;  %v1586_v2 = vadd.f32 %v1585_v5, %v1584_v60  ;;  %v3105_v54 = vpop.permute.xlu2 %2572  ;;  %v2121_v17 = vunpack.c.h.bf16 %v2202_v63  ;;  %v2129_v60 = vunpack.c.h.bf16 %v2204_v39 }
 0x1dd   :  { %v1611_v16 = vsel %vm1230_vm0, %v1220_v10, 0.0  ;;  %v1598_v0 = vsel %vm1230_vm0, %v1216_v42, 0.0  ;;  %v2133_v63 = vunpack.c.h.bf16 %v2205_v33  ;;  %v2141_v39 = vunpack.c.h.bf16 %v2207_v13 }
 0x1de   :  { %v1575_v55 = vadd.f32 %v1574_v22, %v1573_v25  ;;  %v1588_v27 = vadd.f32 %v1587_v19, %v1586_v2  ;;  %v2137_v40 = vunpack.c.h.bf16 %v2206_v61 }
 0x1e0   :  { %v1576_v34 = vrot.slane %v1575_v55, 4  ;;  %v1589_v56 = vrot.slane %v1588_v27, 4 }
 0x1e2   :  { %v1577_v47 = vadd.f32 %v1576_v34, %v1575_v55  ;;  %v1590_v28 = vadd.f32 %v1589_v56, %v1588_v27 }
 0x1e4   :  { %v1578_v24 = vrot.slane %v1577_v47, 2  ;;  %v1591_v37 = vrot.slane %v1590_v28, 2 }
 0x1e6   :  { %v1579_v38 = vadd.f32 %v1578_v24, %v1577_v47  ;;  %v1592_v59 = vadd.f32 %v1591_v37, %v1590_v28  ;;  %v2539_v18 = vpop.permute.xlu1 %2538  ;;  %v2140_v24 = vunpack.c.l.bf16 %v2207_v13  ;;  %v2575_v37 = vunpack.i.h.bf16 %v3105_v54 }
 0x1e7   :  { %v2541_v43 = vunpack.i.h.bf16 %v2539_v18  ;;  %v2540_v46 = vunpack.i.l.bf16 %v2539_v18 }
 0x1e8   :  { %v1580_v36 = vrot.slane %v1579_v38, 1  ;;  %v1593_v41 = vrot.slane %v1592_v59, 1 }
 0x1e9   :  { %v1218_v57 = vmul.f32 %v2541_v43, %v2124_v50  ;;  %v1214_v7 = vmul.f32 %v2540_v46, %v2116_v51  ;;  %v1226_v51 = vmul.f32 %v2575_v37, %v2140_v24 }
 0x1ea   :  { %v1581_v52 = vadd.f32 %v1580_v36, %v1579_v38  ;;  %v1594_v53 = vadd.f32 %v1593_v41, %v1592_v59  ;;  %v2208_v38 = vld [vmem:[#allocation2 + $0x1f8] sm:$0xff]   ;;  %v2590_v59 = vpop.permute.xlu0 %2589  ;;  %v2574_v36 = vunpack.i.l.bf16 %v3105_v54 }
 0x1eb   :  { %v1608_v8 = vsel %vm1230_vm0, %v1218_v57, 0.0  ;;  %v1595_v14 = vsel %vm1230_vm0, %v1214_v7, 0.0  ;;  %v2144_v45 = vunpack.c.l.bf16 %v2208_v38  ;;  %v2145_v43 = vunpack.c.h.bf16 %v2208_v38 }
 0x1ec   :  { %v1831_v48 = vsel %vm1804_vm2, %v1581_v52, %v1830_v58  ;;  %v2585_v15 = vpop.permute.xlu2 %2584  ;;  %v1610_v19 = vadd.f32 %v1609_v12, %v1608_v8  ;;  %v1597_v22 = vadd.f32 %v1596_v62, %v1595_v14  ;;  %v2136_v52 = vunpack.c.l.bf16 %v2206_v61  ;;  %v1703_v58 = vld [vmem:[%s3160_s4] sm:$0x3]  ;;  %v1689_v61 = vpop.f32.mrf.mxu0  ;;  %s2655_s4 = smov [#allocation5]  }
 0x1ed   :  { %v3110_v35 = vsel %vm1806_vm3, %v1594_v53, %v1831_v48  ;;  %v2587_v31 = vunpack.i.h.bf16 %v2585_v15  ;;  %v2586_v53 = vunpack.i.l.bf16 %v2585_v15  ;;  %v2592_v46 = vunpack.i.h.bf16 %v2590_v59  ;;  %s1853_s18 = sshll.u32 %s2655_s4, 4  ;;  %s1854_s18 = int_to_ptr.vmem [resolvable:$true] %s1853_s18 }
 0x1ee   :  { %v1599_v55 = vadd.f32 %v1598_v0, %v1597_v22  ;;  %v1612_v27 = vadd.f32 %v1611_v16, %v1610_v19  ;;  %v2591_v48 = vunpack.i.l.bf16 %v2590_v59  ;;  %v1222_v6 = vmul.f32 %v2574_v36, %v2132_v20 }
 0x1ef   :  { %v1228_v49 = vmul.f32 %v2587_v31, %v2144_v45  ;;  %v1224_v4 = vmul.f32 %v2586_v53, %v2136_v52  ;;  %v3131_v12 = vperm.slane %v1703_v58, 1  ;;  %v1229_v14 = vmul.f32 %v2592_v46, %v2145_v43 }
 0x1f0   :  { %v1225_v15 = vmul.f32 %v2591_v48, %v2137_v40  ;;  %v1634_v19 = vsel %vm1230_vm0, %v1226_v51, 0.0  ;;  %v1621_v22 = vsel %vm1230_vm0, %v1222_v6, 0.0 }
 0x1f1   :  { %v1624_v0 = vsel %vm1230_vm0, %v1224_v4, 0.0 }
 0x1f5   :  { %v3122_v47 = vpop.permute.xlu2 %1711 }
 0x1f6   :  { %v2567_v11 = vpop.permute.xlu1 %2566 }
 0x1f7   :  { %v2569_v5 = vunpack.i.h.bf16 %v2567_v11  ;;  %v2568_v23 = vunpack.i.l.bf16 %v2567_v11  ;;  %v1637_v11 = vsel %vm1230_vm0, %v1228_v49, 0.0 }
 0x1f9   :  { %v1221_v25 = vmul.f32 %v2569_v5, %v2129_v60  ;;  %v1217_v2 = vmul.f32 %v2568_v23, %v2121_v17  ;;  %v1731_v17 = vpop.permute.xlu0 %1730 }
 0x1fa   :  { %v1694_v43 = vpop.f32.mrf.mxu1 }
 0x1fb   :  { %v1613_v26 = vsel %vm1230_vm0, %v1221_v25, 0.0  ;;  %v1600_v32 = vsel %vm1230_vm0, %v1217_v2, 0.0 }
 0x1fc   :  { %v1601_v34 = vadd.f32 %v1600_v32, %v1599_v55  ;;  %v1614_v56 = vadd.f32 %v1613_v26, %v1612_v27  ;;  %v1724_v55 = vperm.slane %v1703_v58, 0  ;;  %v1746_v27 = vsub.f32 %v1731_v17, %v3131_v12 }
 0x1fd   :  { %v3129_v7 = vpop.permute.xlu2 %1721  ;;  %v1626_v26 = vsel %vm1230_vm0, %v1225_v15, 0.0 }
 0x1fe   :  { %v1602_v28 = vrot.slane %v1601_v34, 4  ;;  %v1615_v30 = vrot.slane %v1614_v56, 4  ;;  %v1754_v33 = vmul.f32 %v1746_v27, %v1746_v27 }
 0x200   :  { %v1603_v29 = vadd.f32 %v1602_v28, %v1601_v34  ;;  %v1616_v1 = vadd.f32 %v1615_v30, %v1614_v56 }
 0x202   :  { %v1604_v41 = vrot.slane %v1603_v29, 2  ;;  %v1617_v18 = vrot.slane %v1616_v1, 2 }
 0x204   :  { %v1605_v44 = vadd.f32 %v1604_v41, %v1603_v29  ;;  %v1618_v50 = vadd.f32 %v1617_v18, %v1616_v1 }
 0x206   :  { %v1606_v54 = vrot.slane %v1605_v44, 1  ;;  %v1619_v21 = vrot.slane %v1618_v50, 1  ;;  %v2579_v3 = vpop.permute.xlu1 %2578  ;;  %v1739_v24 = vpop.permute.xlu2 %1738 }
 0x207   :  { %v2581_v9 = vunpack.i.h.bf16 %v2579_v3  ;;  %v2580_v57 = vunpack.i.l.bf16 %v2579_v3  ;;  %v1748_v36 = vsub.f32 %v1739_v24, %v3131_v12 }
 0x208   :  { %v1607_v10 = vadd.f32 %v1606_v54, %v1605_v44  ;;  %v1620_v42 = vadd.f32 %v1619_v21, %v1618_v50  ;;  %v1726_v54 = vsub.f32 %v3122_v47, %v1724_v55 }
 0x209   :  { %v1227_v62 = vmul.f32 %v2581_v9, %v2141_v39  ;;  %v1223_v8 = vmul.f32 %v2580_v57, %v2133_v63  ;;  %v1756_v53 = vmul.f32 %v1748_v36, %v1748_v36  ;;  %v1691_v57 = vpop.f32.mrf.mxu0 }
 0x20a   :  { %v1833_v60 = vsel %vm1808_vm4, %v1607_v10, %v3110_v35  ;;  %v1639_v35 = vsel %vm1230_vm0, %v1229_v14, 0.0  ;;  %v1751_v4 = vmul.f32 %v1726_v54, %v1726_v54 }
 0x20b   :  { %v1834_v16 = vsel %vm1810_vm5, %v1620_v42, %v1833_v60  ;;  %v1635_v5 = vsel %vm1230_vm0, %v1227_v62, 0.0  ;;  %v1622_v23 = vsel %vm1230_vm0, %v1223_v8, 0.0  ;;  %v1728_v42 = vsub.f32 %v3129_v7, %v1724_v55  ;;  %v1696_v60 = vpop.f32.mrf.mxu1 }
 0x20c   :  { %v1636_v25 = vadd.f32 %v1635_v5, %v1634_v19  ;;  %v1623_v2 = vadd.f32 %v1622_v23, %v1621_v22 }
 0x20d   :  { %v1753_v14 = vmul.f32 %v1728_v42, %v1728_v42 }
 0x20e   :  { %v1625_v32 = vadd.f32 %v1624_v0, %v1623_v2  ;;  %v1638_v34 = vadd.f32 %v1637_v11, %v1636_v25 }
 0x20f   :  { %v1707_v56 = vpop.permute.xlu1 %1706 }
 0x210   :  { %v1640_v13 = vadd.f32 %v1639_v35, %v1638_v34  ;;  %v1627_v28 = vadd.f32 %v1626_v26, %v1625_v32  ;;  %v1725_v30 = vsub.f32 %v1707_v56, %v1724_v55 }
 0x212   :  { %v1641_v37 = vrot.slane %v1640_v13, 4  ;;  %v1628_v38 = vrot.slane %v1627_v28, 4  ;;  %v1750_v59 = vmul.f32 %v1725_v30, %v1725_v30 }
 0x214   :  { %v1642_v29 = vadd.f32 %v1641_v37, %v1640_v13  ;;  %v1629_v1 = vadd.f32 %v1628_v38, %v1627_v28  ;;  %v1758_v20 = vadd.f32 %v1754_v33, %v1750_v59 }
 0x216   :  { %v1643_v41 = vrot.slane %v1642_v29, 2  ;;  %v1630_v18 = vrot.slane %v1629_v1, 2  ;;  %vm1762_vm9 = vcmp.lt.f32.partialorder %v1758_v20, 16.0 }
 0x217   :  { %v1766_v45 = vsel %vm1762_vm9, 0.0, %v1689_v61  ;;  %v1717_v31 = vpop.permute.xlu1 %1716 }
 0x218   :  { %v1644_v51 = vadd.f32 %v1643_v41, %v1642_v29  ;;  %v1631_v52 = vadd.f32 %v1630_v18, %v1629_v1  ;;  %1845 = vst [vmem:[#allocation5 + $0x8] sm:$0xff] %v1766_v45  ;;  %v1727_v44 = vsub.f32 %v1717_v31, %v1724_v55 }
 0x21a   :  { %v1645_v50 = vrot.slane %v1644_v51, 1  ;;  %v1632_v63 = vrot.slane %v1631_v52, 1  ;;  %v1752_v39 = vmul.f32 %v1727_v44, %v1727_v44 }
 0x21c   :  { %v1646_v58 = vadd.f32 %v1645_v50, %v1644_v51  ;;  %v1633_v40 = vadd.f32 %v1632_v63, %v1631_v52  ;;  %v1760_v46 = vadd.f32 %v1756_v53, %v1752_v39 }
 0x21e   :  { %v1835_v48 = vsel %vm1812_vm6, %v1633_v40, %v1834_v16  ;;  %vm1764_vm10 = vcmp.lt.f32.partialorder %v1760_v46, 16.0 }
 0x21f   :  { %v1836_v21 = vsel %vm1814_vm7, %v1646_v58, %v1835_v48  ;;  %v1768_v6 = vsel %vm1764_vm10, 0.0, %v1694_v43 }
 0x220   :  { %1844 = vst.msk [vmem:[#allocation5 + $0x30] sm:$0xff] %vm1230_vm0, %v1836_v21  ;;  %v1735_v49 = vpop.permute.xlu1 %1734 }
 0x221   :  { %1847 = vst [vmem:[#allocation5 + $0x28] sm:$0xff] %v1768_v6  ;;  %v1747_v3 = vsub.f32 %v1735_v49, %v3131_v12 }
 0x223   :  { %v1755_v9 = vmul.f32 %v1747_v3, %v1747_v3 }
 0x225   :  { %v1759_v10 = vadd.f32 %v1755_v9, %v1751_v4 }
 0x227   :  { %vm1763_vm11 = vcmp.lt.f32.partialorder %v1759_v10, 16.0 }
 0x228   :  { %v1767_v62 = vsel %vm1763_vm11, 0.0, %v1691_v57  ;;  %v1743_v8 = vpop.permute.xlu1 %1742 }
 0x229   :  { %1846 = vst [vmem:[#allocation5 + $0x18] sm:$0xff] %v1767_v62  ;;  %v1749_v47 = vsub.f32 %v1743_v8, %v3131_v12 }
 0x22b   :  { %v1757_v15 = vmul.f32 %v1749_v47, %v1749_v47 }
 0x22d   :  { %v1761_v17 = vadd.f32 %v1757_v15, %v1753_v14 }
 0x22f   :  { %vm1765_vm12 = vcmp.lt.f32.partialorder %v1761_v17, 16.0 }
 0x230   :  { %v1769_v7 = vsel %vm1765_vm12, 0.0, %v1696_v60 }
 0x231   :  { %1848 = vst [vmem:[#allocation5 + $0x38] sm:$0xff] %v1769_v7 }
 0x232   :  { %1861 = dma.vmem_to_hbm [thread:$0]  %s1854_s18, 1024, %s1856_s21, [#allocation4], %s2656_s22, %s2656_s22, %s2657_s23  }
 0x233   :  { %2648 = dma.done.wait [#allocation4], 1024  }
 0x234   :  { %2649 = vsyncadd [#allocation4], 4294966272 }
 0x235   :  { %1866 = vsyncpa [#allocation3], 1 }
 0x236   :  { %1867 = vsyncpa [#allocation4], 1 }

</bundles_post_ra>
